<compile_context>
chip_gen: v7x
topology: tpu7x:2x2x1
jax: 0.10.0
libtpu: 0.0.40
codegen_flags: <defaults>
</compile_context>

<pallas_src>
import functools

import jax
import jax.numpy as jnp
from jax import lax
from jax.experimental import pallas as pl
from jax.experimental.pallas import tpu as pltpu

_HAS_BUFFERED = hasattr(pl, "Buffered")


def _round_up(x, n):
    return ((x + n - 1) // n) * n


def _vmem_budget_bytes():
    """~85% of per-core VMEM capacity; conservative 64 MiB fallback (v7x per-TC)."""
    try:
        cap = int(pltpu.get_tpu_info().vmem_capacity_bytes)
    except Exception:
        cap = 64 * 1024 * 1024
    return int(0.85 * cap)


def _lane_align():
    """Feature-dim alignment: 256 for 256x256 MXUs (v6e/v7x), 128 for v5e and older."""
    try:
        kind = jax.devices()[0].device_kind.lower()
    except Exception:
        return 128
    if any(v in kind for v in ("v2", "v3", "v4", "v5")):
        return 128
    return 256


def _ff_kernel(x_ref, w1_ref, b1_ref, w2_ref, b2_ref, o_ref, acc_ref, *,
               approximate_gelu):
    k = pl.program_id(1)

    @pl.when(k == 0)
    def _():
        acc_ref[...] = jnp.zeros_like(acc_ref)

    # (TM, dim_p) @ (dim_p, TH) -> (TM, TH), f32 accumulation on the MXU.
    h = jnp.dot(x_ref[...], w1_ref[...], preferred_element_type=jnp.float32)
    h = h + b1_ref[...].astype(jnp.float32)          # bias in f32 accumulator
    # approximate=True -> tanh GELU (EUP slot, free while MXU runs);
    # approximate=False -> exact erf (strict torch.nn.GELU parity).
    h = jax.nn.gelu(h, approximate=approximate_gelu)
    # (TM, TH) @ (TH, dout_p), accumulated over hidden chunks into VMEM scratch.
    acc_ref[...] += jnp.dot(h.astype(w2_ref.dtype), w2_ref[...],
                            preferred_element_type=jnp.float32)

    @pl.when(k == pl.num_programs(1) - 1)
    def _():
        o_ref[...] = (acc_ref[...] + b2_ref[...].astype(jnp.float32)
                      ).astype(o_ref.dtype)


def _block_spec(shape, index_map, *, single_buffer):
    if single_buffer and _HAS_BUFFERED:
        try:
            return pl.BlockSpec(shape, index_map, pipeline_mode=pl.Buffered(1))
        except TypeError:
            pass
    return pl.BlockSpec(shape, index_map)


def make_feedforward(w1, b1, w2, b2, *, approximate_gelu=True, compute_dtype=None):
    """Plans tiles and pads the parameters once; returns apply(x).

    w1: (dim, hidden), b1: (hidden,), w2: (hidden, dim_out), b2: (dim_out,)
    (i.e. PyTorch Linear weights already transposed to (in, out) layout).
    compute_dtype=jnp.bfloat16 gives full MXU throughput (f32 accumulation kept).
    """
    dim, hidden = w1.shape
    hidden2, dim_out = w2.shape
    assert hidden2 == hidden and b1.shape == (hidden,) and b2.shape == (dim_out,)

    if compute_dtype is not None:
        w1 = w1.astype(compute_dtype)
        w2 = w2.astype(compute_dtype)

    align = _lane_align()
    budget = _vmem_budget_bytes()
    wb = jnp.dtype(w1.dtype).itemsize

    dim_p = _round_up(dim, align)
    dout_p = _round_up(dim_out, align)

    # Hidden (reduction) chunk: keep weights fully resident & single-buffered if
    # they fit in ~half the VMEM budget, else stream double-buffered chunks over
    # a trailing "arbitrary" grid axis.
    def _w_bytes(th, nbuf):
        return nbuf * (dim_p * th + th * dout_p + th + dout_p) * wb

    th = _round_up(hidden, align)
    if _w_bytes(th, 1) > budget // 2:
        th = min(th, _round_up(2048, align))
        while th > align and _w_bytes(th, 2) > budget // 2:
            th = max(align, _round_up(th // 2, align))
    hid_p = _round_up(hidden, th)
    nk = hid_p // th
    single_buffer_weights = nk == 1

    # Pad parameters once. Zero padding is exact: padded K columns contribute 0,
    # GELU(0)=0, padded W2 rows are 0, padded output lanes are sliced off.
    w1_p = (jnp.pad(w1, ((0, dim_p - dim), (0, hid_p - hidden)))
            if (dim_p, hid_p) != w1.shape else w1)
    w2_p = (jnp.pad(w2, ((0, hid_p - hidden), (0, dout_p - dim_out)))
            if (hid_p, dout_p) != w2.shape else w2)
    b1_p = (jnp.pad(b1, (0, hid_p - hidden)) if hid_p != hidden else b1
            ).astype(w1_p.dtype).reshape(1, hid_p)
    b2_p = (jnp.pad(b2, (0, dout_p - dim_out)) if dout_p != dim_out else b2
            ).astype(w2_p.dtype).reshape(1, dout_p)

    kernel = functools.partial(_ff_kernel, approximate_gelu=approximate_gelu)

    def apply(x):
        lead = x.shape[:-1]
        assert x.shape[-1] == dim
        if compute_dtype is not None:
            x = x.astype(compute_dtype)
        out_dtype = x.dtype
        xb = jnp.dtype(out_dtype).itemsize

        m = 1
        for s in lead:
            m *= s

        # Row tile from the VMEM left after the (single-buffered) weights.
        w_foot = _w_bytes(th, 1 if single_buffer_weights else 2)
        remaining = max(budget - w_foot, 1 << 20)
        per_row = xb * 2 * (dim_p + dout_p) + 4 * dout_p + (8 + wb) * th
        tm = max(8, (remaining // per_row) // 8 * 8)
        tm = min(tm, 2048, _round_up(m, 8))
        m_p = _round_up(m, tm)

        x2d = x.reshape(m, dim)
        if (m_p, dim_p) != (m, dim):
            x2d = jnp.pad(x2d, ((0, m_p - m), (0, dim_p - dim)))

        grid = (m_p // tm, nk)
        w_stream = 1 if nk == 1 else (m_p // tm)
        cost = pl.CostEstimate(
            flops=2 * m_p * dim_p * hid_p + 2 * m_p * hid_p * dout_p,
            transcendentals=m_p * hid_p if approximate_gelu else 0,
            bytes_accessed=(m_p * dim_p * xb + m_p * dout_p * xb
                            + w_stream * (dim_p * hid_p + hid_p * dout_p) * wb
                            + (hid_p + dout_p) * wb),
        )

        def run(allow_single_buffer):
            sb_w = allow_single_buffer and single_buffer_weights
            in_specs = [
                # streamed x row tiles (constant over k -> no re-DMA within a tile)
                pl.BlockSpec((tm, dim_p), lambda i, k: (i, 0)),
                # W1 / b1 hidden chunks
                _block_spec((dim_p, th), lambda i, k: (0, k), single_buffer=sb_w),
                _block_spec((1, th), lambda i, k: (0, k), single_buffer=sb_w),
                # W2 hidden chunks
                _block_spec((th, dout_p), lambda i, k: (k, 0), single_buffer=sb_w),
                # b2 is constant over the whole grid
                _block_spec((1, dout_p), lambda i, k: (0, 0),
                            single_buffer=allow_single_buffer),
            ]
            return pl.pallas_call(
                kernel,
                out_shape=jax.ShapeDtypeStruct((m_p, dout_p), out_dtype),
                grid=grid,
                in_specs=in_specs,
                out_specs=pl.BlockSpec((tm, dout_p), lambda i, k: (i, 0)),
                scratch_shapes=[pltpu.VMEM((tm, dout_p), jnp.float32)],
                compiler_params=pltpu.CompilerParams(
                    dimension_semantics=("parallel", "arbitrary"),
                    vmem_limit_bytes=budget,
                ),
                cost_estimate=cost,
            )(x2d, w1_p, b1_p, w2_p, b2_p)

        try:
            out2d = run(True)
        except Exception:
            # Retry without Buffered(1) hints if this JAX build rejects them.
            out2d = run(False)

        if (m_p, dout_p) != (m, dim_out):
            out2d = out2d[:m, :dim_out]
        return out2d.reshape(*lead, dim_out)

    return apply


def feedforward_ref(x, w1, b1, w2, b2, *, approximate_gelu=True):
    h = jax.nn.gelu(jnp.dot(x, w1, precision=lax.Precision.HIGHEST) + b1,
                    approximate=approximate_gelu)
    return jnp.dot(h, w2, precision=lax.Precision.HIGHEST) + b2


if __name__ == "__main__":
    # FeedForward(dim=32, mult=4, glu=False, dropout=0.0): hidden=128, dim_out=32.
    # Dropout(p=0.0) is the identity in the forward pass; GEGLU branch unused.
    batch, seq, dim, mult = 2, 8, 32, 4
    hidden, dim_out = dim * mult, dim

    key = jax.random.PRNGKey(0)
    kx, kw1, kb1, kw2, kb2 = jax.random.split(key, 5)
    x = jax.random.normal(kx, (batch, seq, dim), jnp.float32)
    # nn.Linear params, stored transposed to (in, out) layout.
    w1 = jax.random.normal(kw1, (dim, hidden), jnp.float32) * 0.05
    b1 = jax.random.normal(kb1, (hidden,), jnp.float32) * 0.05
    w2 = jax.random.normal(kw2, (hidden, dim_out), jnp.float32) * 0.05
    b2 = jax.random.normal(kb2, (dim_out,), jnp.float32) * 0.05

    ff = make_feedforward(w1, b1, w2, b2, approximate_gelu=True)
    out = ff(x)
    jax.block_until_ready(out)

    ref = feedforward_ref(x, w1, b1, w2, b2, approximate_gelu=True)
    assert out.shape == (batch, seq, dim_out)
    max_err = float(jnp.max(jnp.abs(out - ref)))
    assert jnp.allclose(out, ref, atol=5e-3, rtol=5e-3), (
        f"mismatch vs reference, max abs err {max_err}")
    print("KERNEL_OK")
</pallas_src>

<mosaic_0001>
module attributes {stable_mosaic.version = 11 : i64} {
  func.func @_ff_kernel(%arg0: i32, %arg1: i32, %arg2: memref<16x256xf32, #tpu.memory_space<vmem>>, %arg3: memref<256x256xf32, #tpu.memory_space<vmem>>, %arg4: memref<1x256xf32, #tpu.memory_space<vmem>>, %arg5: memref<256x256xf32, #tpu.memory_space<vmem>>, %arg6: memref<1x256xf32, #tpu.memory_space<vmem>>, %arg7: memref<16x256xf32, #tpu.memory_space<vmem>>, %arg8: memref<16x256xf32, #tpu.memory_space<vmem>>) attributes {dimension_semantics = [#tpu.dimension_semantics<parallel>, #tpu.dimension_semantics<arbitrary>], iteration_bounds = array<i64: 1, 1>, scalar_prefetch = 0 : i64, scratch_operands = 1 : i64, tpu.core_type = #tpu.core_type<tc>, window_params = [{transform_indices = @transform_0, window_bounds = array<i64: 16, 256>}, {pipeline_mode = #tpu.pipeline_mode<synchronous>, transform_indices = @transform_1, window_bounds = array<i64: 256, 256>}, {pipeline_mode = #tpu.pipeline_mode<synchronous>, transform_indices = @transform_2, window_bounds = array<i64: 1, 256>}, {pipeline_mode = #tpu.pipeline_mode<synchronous>, transform_indices = @transform_3, window_bounds = array<i64: 256, 256>}, {pipeline_mode = #tpu.pipeline_mode<synchronous>, transform_indices = @transform_4, window_bounds = array<i64: 1, 256>}, {transform_indices = @transform_5, window_bounds = array<i64: 16, 256>}]} {
    %c0_i32 = arith.constant 0 : i32
    %0 = arith.cmpi eq, %arg1, %c0_i32 : i32
    %1 = arith.extui %0 : i1 to i32
    %c0_i32_0 = arith.constant 0 : i32
    %2 = arith.cmpi ne, %1, %c0_i32_0 : i32
    scf.if %2 {
      %cst_19 = arith.constant 0.000000e+00 : f32
      %30 = vector.broadcast %cst_19 : f32 to vector<16x256xf32>
      %c0_20 = arith.constant 0 : index
      %c0_21 = arith.constant 0 : index
      %31 = vector.load %arg8[%c0_20, %c0_21] : memref<16x256xf32, #tpu.memory_space<vmem>>, vector<16x256xf32>
      tpu.vector_store %arg8[%c0_20, %c0_21], %30 {strides = array<i32>} : memref<16x256xf32, #tpu.memory_space<vmem>>, vector<16x256xf32>,
    } else {
    }
    %c0 = arith.constant 0 : index
    %c0_1 = arith.constant 0 : index
    %3 = vector.load %arg2[%c0, %c0_1] : memref<16x256xf32, #tpu.memory_space<vmem>>, vector<16x256xf32>
    %c0_2 = arith.constant 0 : index
    %c0_3 = arith.constant 0 : index
    %4 = vector.load %arg3[%c0_2, %c0_3] : memref<256x256xf32, #tpu.memory_space<vmem>>, vector<256x256xf32>
    %cst = arith.constant dense<0.000000e+00> : vector<16x256xf32>
    %5 = tpu.matmul %3, %4, %cst {dimension_numbers = #tpu.dot_dimension_numbers<[1], [0], [0], [1], [0, 0, 1, 1], [], []>} : vector<16x256xf32>, vector<256x256xf32>, vector<16x256xf32> -> vector<16x256xf32>
    %c0_4 = arith.constant 0 : index
    %c0_5 = arith.constant 0 : index
    %6 = vector.load %arg4[%c0_4, %c0_5] : memref<1x256xf32, #tpu.memory_space<vmem>>, vector<1x256xf32>
    %7 = vector.broadcast %6 : vector<1x256xf32> to vector<16x256xf32>
    %8 = arith.addf %5, %7 : vector<16x256xf32>
    %9 = arith.mulf %8, %8 : vector<16x256xf32>
    %10 = arith.mulf %8, %9 : vector<16x256xf32>
    %cst_6 = arith.constant 4.471500e-02 : f32
    %11 = vector.broadcast %cst_6 : f32 to vector<16x256xf32>
    %12 = arith.mulf %11, %10 : vector<16x256xf32>
    %13 = arith.addf %8, %12 : vector<16x256xf32>
    %cst_7 = arith.constant 0.797884583 : f32
    %14 = vector.broadcast %cst_7 : f32 to vector<16x256xf32>
    %15 = arith.mulf %14, %13 : vector<16x256xf32>
    %16 = math.tanh %15 : vector<16x256xf32>
    %cst_8 = arith.constant 1.000000e+00 : f32
    %17 = vector.broadcast %cst_8 : f32 to vector<16x256xf32>
    %18 = arith.addf %17, %16 : vector<16x256xf32>
    %cst_9 = arith.constant 5.000000e-01 : f32
    %19 = vector.broadcast %cst_9 : f32 to vector<16x256xf32>
    %20 = arith.mulf %19, %18 : vector<16x256xf32>
    %21 = arith.mulf %8, %20 : vector<16x256xf32>
    %c0_10 = arith.constant 0 : index
    %c0_11 = arith.constant 0 : index
    %22 = vector.load %arg8[%c0_10, %c0_11] : memref<16x256xf32, #tpu.memory_space<vmem>>, vector<16x256xf32>
    %c0_12 = arith.constant 0 : index
    %c0_13 = arith.constant 0 : index
    %23 = vector.load %arg5[%c0_12, %c0_13] : memref<256x256xf32, #tpu.memory_space<vmem>>, vector<256x256xf32>
    %cst_14 = arith.constant dense<0.000000e+00> : vector<16x256xf32>
    %24 = tpu.matmul %21, %23, %cst_14 {dimension_numbers = #tpu.dot_dimension_numbers<[1], [0], [0], [1], [0, 0, 1, 1], [], []>} : vector<16x256xf32>, vector<256x256xf32>, vector<16x256xf32> -> vector<16x256xf32>
    %25 = arith.addf %22, %24 : vector<16x256xf32>
    %c0_15 = arith.constant 0 : index
    %c0_16 = arith.constant 0 : index
    %26 = vector.load %arg8[%c0_15, %c0_16] : memref<16x256xf32, #tpu.memory_space<vmem>>, vector<16x256xf32>
    tpu.vector_store %arg8[%c0_15, %c0_16], %25 {strides = array<i32>} : memref<16x256xf32, #tpu.memory_space<vmem>>, vector<16x256xf32>,
    %c0_i32_17 = arith.constant 0 : i32
    %27 = arith.cmpi eq, %arg1, %c0_i32_17 : i32
    %28 = arith.extui %27 : i1 to i32
    %c0_i32_18 = arith.constant 0 : i32
    %29 = arith.cmpi ne, %28, %c0_i32_18 : i32
    scf.if %29 {
      %c0_19 = arith.constant 0 : index
      %c0_20 = arith.constant 0 : index
      %30 = vector.load %arg8[%c0_19, %c0_20] : memref<16x256xf32, #tpu.memory_space<vmem>>, vector<16x256xf32>
      %c0_21 = arith.constant 0 : index
      %c0_22 = arith.constant 0 : index
      %31 = vector.load %arg6[%c0_21, %c0_22] : memref<1x256xf32, #tpu.memory_space<vmem>>, vector<1x256xf32>
      %32 = vector.broadcast %31 : vector<1x256xf32> to vector<16x256xf32>
      %33 = arith.addf %30, %32 : vector<16x256xf32>
      %c0_23 = arith.constant 0 : index
      %c0_24 = arith.constant 0 : index
      %34 = vector.load %arg7[%c0_23, %c0_24] : memref<16x256xf32, #tpu.memory_space<vmem>>, vector<16x256xf32>
      tpu.vector_store %arg7[%c0_23, %c0_24], %33 {strides = array<i32>} : memref<16x256xf32, #tpu.memory_space<vmem>>, vector<16x256xf32>,
    } else {
    }
    return
  }
  func.func @transform_0(%arg0: i32, %arg1: i32) -> (i32, i32) {
    %c0_i32 = arith.constant 0 : i32
    %c0_i32_0 = arith.constant 0 : i32
    return %arg0, %c0_i32 : i32, i32
  }
  func.func @transform_1(%arg0: i32, %arg1: i32) -> (i32, i32) {
    %c0_i32 = arith.constant 0 : i32
    %c0_i32_0 = arith.constant 0 : i32
    return %c0_i32, %arg1 : i32, i32
  }
  func.func @transform_2(%arg0: i32, %arg1: i32) -> (i32, i32) {
    %c0_i32 = arith.constant 0 : i32
    %c0_i32_0 = arith.constant 0 : i32
    return %c0_i32, %arg1 : i32, i32
  }
  func.func @transform_3(%arg0: i32, %arg1: i32) -> (i32, i32) {
    %c0_i32 = arith.constant 0 : i32
    %c0_i32_0 = arith.constant 0 : i32
    return %arg1, %c0_i32 : i32, i32
  }
  func.func @transform_4(%arg0: i32, %arg1: i32) -> (i32, i32) {
    %c0_i32 = arith.constant 0 : i32
    %c0_i32_0 = arith.constant 0 : i32
    %c0_i32_1 = arith.constant 0 : i32
    return %c0_i32, %c0_i32_0 : i32, i32
  }
  func.func @transform_5(%arg0: i32, %arg1: i32) -> (i32, i32) {
    %c0_i32 = arith.constant 0 : i32
    %c0_i32_0 = arith.constant 0 : i32
    return %arg0, %c0_i32 : i32, i32
  }
}

module attributes {stable_mosaic.version = 11 : i64} {
  func.func @_ff_kernel(%arg0: i32, %arg1: i32, %arg2: memref<16x256xf32, #tpu.memory_space<vmem>>, %arg3: memref<256x256xf32, #tpu.memory_space<vmem>>, %arg4: memref<1x256xf32, #tpu.memory_space<vmem>>, %arg5: memref<256x256xf32, #tpu.memory_space<vmem>>, %arg6: memref<1x256xf32, #tpu.memory_space<vmem>>, %arg7: memref<16x256xf32, #tpu.memory_space<vmem>>, %arg8: memref<16x256xf32, #tpu.memory_space<vmem>>) attributes {dimension_semantics = [#tpu.dimension_semantics<parallel>, #tpu.dimension_semantics<arbitrary>], iteration_bounds = array<i64: 1, 1>, scalar_prefetch = 0 : i64, scratch_operands = 1 : i64, tpu.core_type = #tpu.core_type<tc>, window_params = [{transform_indices = @transform_0, window_bounds = array<i64: 16, 256>}, {transform_indices = @transform_1, window_bounds = array<i64: 256, 256>}, {transform_indices = @transform_2, window_bounds = array<i64: 1, 256>}, {transform_indices = @transform_3, window_bounds = array<i64: 256, 256>}, {pipeline_mode = #tpu.pipeline_mode<synchronous>, transform_indices = @transform_4, window_bounds = array<i64: 1, 256>}, {transform_indices = @transform_5, window_bounds = array<i64: 16, 256>}]} {
    %c0_i32 = arith.constant 0 : i32
    %0 = arith.cmpi eq, %arg1, %c0_i32 : i32
    %1 = arith.extui %0 : i1 to i32
    %c0_i32_0 = arith.constant 0 : i32
    %2 = arith.cmpi ne, %1, %c0_i32_0 : i32
    scf.if %2 {
      %cst_19 = arith.constant 0.000000e+00 : f32
      %30 = vector.broadcast %cst_19 : f32 to vector<16x256xf32>
      %c0_20 = arith.constant 0 : index
      %c0_21 = arith.constant 0 : index
      %31 = vector.load %arg8[%c0_20, %c0_21] : memref<16x256xf32, #tpu.memory_space<vmem>>, vector<16x256xf32>
      tpu.vector_store %arg8[%c0_20, %c0_21], %30 {strides = array<i32>} : memref<16x256xf32, #tpu.memory_space<vmem>>, vector<16x256xf32>,
    } else {
    }
    %c0 = arith.constant 0 : index
    %c0_1 = arith.constant 0 : index
    %3 = vector.load %arg2[%c0, %c0_1] : memref<16x256xf32, #tpu.memory_space<vmem>>, vector<16x256xf32>
    %c0_2 = arith.constant 0 : index
    %c0_3 = arith.constant 0 : index
    %4 = vector.load %arg3[%c0_2, %c0_3] : memref<256x256xf32, #tpu.memory_space<vmem>>, vector<256x256xf32>
    %cst = arith.constant dense<0.000000e+00> : vector<16x256xf32>
    %5 = tpu.matmul %3, %4, %cst {dimension_numbers = #tpu.dot_dimension_numbers<[1], [0], [0], [1], [0, 0, 1, 1], [], []>} : vector<16x256xf32>, vector<256x256xf32>, vector<16x256xf32> -> vector<16x256xf32>
    %c0_4 = arith.constant 0 : index
    %c0_5 = arith.constant 0 : index
    %6 = vector.load %arg4[%c0_4, %c0_5] : memref<1x256xf32, #tpu.memory_space<vmem>>, vector<1x256xf32>
    %7 = vector.broadcast %6 : vector<1x256xf32> to vector<16x256xf32>
    %8 = arith.addf %5, %7 : vector<16x256xf32>
    %9 = arith.mulf %8, %8 : vector<16x256xf32>
    %10 = arith.mulf %8, %9 : vector<16x256xf32>
    %cst_6 = arith.constant 4.471500e-02 : f32
    %11 = vector.broadcast %cst_6 : f32 to vector<16x256xf32>
    %12 = arith.mulf %11, %10 : vector<16x256xf32>
    %13 = arith.addf %8, %12 : vector<16x256xf32>
    %cst_7 = arith.constant 0.797884583 : f32
    %14 = vector.broadcast %cst_7 : f32 to vector<16x256xf32>
    %15 = arith.mulf %14, %13 : vector<16x256xf32>
    %16 = math.tanh %15 : vector<16x256xf32>
    %cst_8 = arith.constant 1.000000e+00 : f32
    %17 = vector.broadcast %cst_8 : f32 to vector<16x256xf32>
    %18 = arith.addf %17, %16 : vector<16x256xf32>
    %cst_9 = arith.constant 5.000000e-01 : f32
    %19 = vector.broadcast %cst_9 : f32 to vector<16x256xf32>
    %20 = arith.mulf %19, %18 : vector<16x256xf32>
    %21 = arith.mulf %8, %20 : vector<16x256xf32>
    %c0_10 = arith.constant 0 : index
    %c0_11 = arith.constant 0 : index
    %22 = vector.load %arg8[%c0_10, %c0_11] : memref<16x256xf32, #tpu.memory_space<vmem>>, vector<16x256xf32>
    %c0_12 = arith.constant 0 : index
    %c0_13 = arith.constant 0 : index
    %23 = vector.load %arg5[%c0_12, %c0_13] : memref<256x256xf32, #tpu.memory_space<vmem>>, vector<256x256xf32>
    %cst_14 = arith.constant dense<0.000000e+00> : vector<16x256xf32>
    %24 = tpu.matmul %21, %23, %cst_14 {dimension_numbers = #tpu.dot_dimension_numbers<[1], [0], [0], [1], [0, 0, 1, 1], [], []>} : vector<16x256xf32>, vector<256x256xf32>, vector<16x256xf32> -> vector<16x256xf32>
    %25 = arith.addf %22, %24 : vector<16x256xf32>
    %c0_15 = arith.constant 0 : index
    %c0_16 = arith.constant 0 : index
    %26 = vector.load %arg8[%c0_15, %c0_16] : memref<16x256xf32, #tpu.memory_space<vmem>>, vector<16x256xf32>
    tpu.vector_store %arg8[%c0_15, %c0_16], %25 {strides = array<i32>} : memref<16x256xf32, #tpu.memory_space<vmem>>, vector<16x256xf32>,
    %c0_i32_17 = arith.constant 0 : i32
    %27 = arith.cmpi eq, %arg1, %c0_i32_17 : i32
    %28 = arith.extui %27 : i1 to i32
    %c0_i32_18 = arith.constant 0 : i32
    %29 = arith.cmpi ne, %28, %c0_i32_18 : i32
    scf.if %29 {
      %c0_19 = arith.constant 0 : index
      %c0_20 = arith.constant 0 : index
      %30 = vector.load %arg8[%c0_19, %c0_20] : memref<16x256xf32, #tpu.memory_space<vmem>>, vector<16x256xf32>
      %c0_21 = arith.constant 0 : index
      %c0_22 = arith.constant 0 : index
      %31 = vector.load %arg6[%c0_21, %c0_22] : memref<1x256xf32, #tpu.memory_space<vmem>>, vector<1x256xf32>
      %32 = vector.broadcast %31 : vector<1x256xf32> to vector<16x256xf32>
      %33 = arith.addf %30, %32 : vector<16x256xf32>
      %c0_23 = arith.constant 0 : index
      %c0_24 = arith.constant 0 : index
      %34 = vector.load %arg7[%c0_23, %c0_24] : memref<16x256xf32, #tpu.memory_space<vmem>>, vector<16x256xf32>
      tpu.vector_store %arg7[%c0_23, %c0_24], %33 {strides = array<i32>} : memref<16x256xf32, #tpu.memory_space<vmem>>, vector<16x256xf32>,
    } else {
    }
    return
  }
  func.func @transform_0(%arg0: i32, %arg1: i32) -> (i32, i32) {
    %c0_i32 = arith.constant 0 : i32
    %c0_i32_0 = arith.constant 0 : i32
    return %arg0, %c0_i32 : i32, i32
  }
  func.func @transform_1(%arg0: i32, %arg1: i32) -> (i32, i32) {
    %c0_i32 = arith.constant 0 : i32
    %c0_i32_0 = arith.constant 0 : i32
    return %c0_i32, %arg1 : i32, i32
  }
  func.func @transform_2(%arg0: i32, %arg1: i32) -> (i32, i32) {
    %c0_i32 = arith.constant 0 : i32
    %c0_i32_0 = arith.constant 0 : i32
    return %c0_i32, %arg1 : i32, i32
  }
  func.func @transform_3(%arg0: i32, %arg1: i32) -> (i32, i32) {
    %c0_i32 = arith.constant 0 : i32
    %c0_i32_0 = arith.constant 0 : i32
    return %arg1, %c0_i32 : i32, i32
  }
  func.func @transform_4(%arg0: i32, %arg1: i32) -> (i32, i32) {
    %c0_i32 = arith.constant 0 : i32
    %c0_i32_0 = arith.constant 0 : i32
    %c0_i32_1 = arith.constant 0 : i32
    return %c0_i32, %c0_i32_0 : i32, i32
  }
  func.func @transform_5(%arg0: i32, %arg1: i32) -> (i32, i32) {
    %c0_i32 = arith.constant 0 : i32
    %c0_i32_0 = arith.constant 0 : i32
    return %arg0, %c0_i32 : i32, i32
  }
}

</mosaic_0001>

<bundles_post_ra>
// kernel: tpu_custom_call.1
= control target key start
LH: loop header
LB: loop body
LE: loop exit
PB: predicated region body
PF: predicated region fallthrough
CT: control target
= control target key end

     0   :  { %10 = vsyncpa [#allocation4], 0  ;;  %s806_s0 = inlined_call_operand.hbm [shape: f32[16,256], index: 0, kind: input, shape index: {}]   ;;  %s807_s1 = inlined_call_operand.hbm [shape: f32[256,256], index: 1, kind: input, shape index: {}]   ;;  %s808_s2 = inlined_call_operand.vmem [shape: f32[1,256], index: 2, kind: input, shape index: {}]   ;;  %s809_s3 = inlined_call_operand.hbm [shape: f32[256,256], index: 3, kind: input, shape index: {}]   ;;  %s810_s4 = inlined_call_operand.vmem [shape: f32[1,256], index: 4, kind: input, shape index: {}]   ;;  %s811_s5 = inlined_call_operand.hbm [shape: f32[16,256], index: 5, kind: output, shape index: {}]  }
   0x1   :  { %11 = vsyncpa [#allocation7], 0 }
   0x2   :  { %12 = vsyncpa [#allocation5], 0  ;;  %s697_s18 = smov [#allocation6]   ;;  %s698_s20 = smov [#allocation3]  }
   0x3   :  { %s30_s19 = sshll.u32 %s697_s18, 4  ;;  %s18_s21 = sshll.u32 %s698_s20, 4  ;;  %s31_s19 = int_to_ptr.vmem [resolvable:$true] %s30_s19  ;;  %s733_s21 = int_to_ptr.vmem [resolvable:$true] %s18_s21 }
   0x4   :  { %s603_s24 = scalar_lea.hbm %s807_s1, 8192 }
   0x5   :  { %p604_p0 = scmp.ne.s32.totalorder %s807_s1, %s603_s24  ;;  %p607_p1 = scmp.lt.u32.totalorder %s603_s24, %s807_s1 }
   0x7   :  { %p609_p2 = pnand %p607_p1, %p604_p0 }
   0x9   :  { %612 = shalt.err (!%p609_p2)
}
   0xa   :  { %s613_s29 = scalar_lea.vmem %s31_s19, 8192  ;;  %p618_p4 = scmp.lt.s32.totalorder %s31_s19, %s31_s19 }
   0xb   :  { %p614_p3 = scmp.ne.s32.totalorder %s31_s19, %s613_s29  ;;  %p619_p5 = scmp.lt.s32.totalorder %s613_s29, %s613_s29 }
   0xd   :  { %p620_p6 = por %p619_p5, %p618_p4 }
   0xf   :  { %p621_p7 = pnand %p620_p6, %p614_p3 }
  0x11   :  { %624 = shalt.err (!%p621_p7)
}
  0x12   :  { %s699_s30 = smov 256   ;;  %s700_s6 = smov 16  }
  0x13   :  { %36 = dma.hbm_to_vmem [thread:$0]  %s807_s1, 8192, %s31_s19, [#allocation7], %s699_s30, %s699_s30, %s700_s6  }
  0x14   :  { %s625_s11 = scalar_lea.hbm %s806_s0, 512 }
  0x15   :  { %p626_p8 = scmp.ne.s32.totalorder %s806_s0, %s625_s11  ;;  %p629_p9 = scmp.lt.u32.totalorder %s625_s11, %s806_s0 }
  0x17   :  { %p631_p10 = pnand %p629_p9, %p626_p8 }
  0x19   :  { %634 = shalt.err (!%p631_p10)
}
  0x1a   :  { %s635_s16 = scalar_lea.vmem %s733_s21, 512  ;;  %p640_p12 = scmp.lt.s32.totalorder %s733_s21, %s733_s21 }
  0x1b   :  { %p636_p11 = scmp.ne.s32.totalorder %s733_s21, %s635_s16  ;;  %p641_p13 = scmp.lt.s32.totalorder %s635_s16, %s635_s16 }
  0x1d   :  { %p642_p0 = por %p641_p13, %p640_p12 }
  0x1f   :  { %p643_p1 = pnand %p642_p0, %p636_p11 }
  0x21   :  { %646 = shalt.err (!%p643_p1)
}
  0x22   :  { %24 = dma.hbm_to_vmem [thread:$0]  %s806_s0, 512, %s733_s21, [#allocation4], %s699_s30, %s699_s30, %s700_s6  }
  0x23   :  { %s701_s18 = smov [#allocation8]   ;;  %s647_s23 = scalar_lea.hbm %s809_s3, 8192 }
  0x24   :  { %s44_s19 = sshll.u32 %s701_s18, 4  ;;  %p648_p2 = scmp.ne.s32.totalorder %s809_s3, %s647_s23  ;;  %s45_s19 = int_to_ptr.vmem [resolvable:$true] %s44_s19 }
  0x25   :  { %p651_p3 = scmp.lt.u32.totalorder %s647_s23, %s809_s3 }
  0x27   :  { %p653_p4 = pnand %p651_p3, %p648_p2 }
  0x29   :  { %656 = shalt.err (!%p653_p4)
}
  0x2a   :  { %s657_s28 = scalar_lea.vmem %s45_s19, 8192  ;;  %p662_p6 = scmp.lt.s32.totalorder %s45_s19, %s45_s19 }
  0x2b   :  { %p658_p5 = scmp.ne.s32.totalorder %s45_s19, %s657_s28  ;;  %p663_p7 = scmp.lt.s32.totalorder %s657_s28, %s657_s28 }
  0x2d   :  { %p664_p8 = por %p663_p7, %p662_p6 }
  0x2f   :  { %p665_p9 = pnand %p664_p8, %p658_p5 }
  0x31   :  { %668 = shalt.err (!%p665_p9)
}
  0x32   :  { %50 = dma.hbm_to_vmem [thread:$0]  %s809_s3, 8192, %s45_s19, [#allocation7], %s699_s30, %s699_s30, %s700_s6  }
  0x33   :  { %691 = dma.done.wait [#allocation4], 512  }
  0x34   :  { %692 = vsyncadd [#allocation4], 4294966784 }
  0x35   :  { %693 = dma.done.wait [#allocation7], 16384  }
  0x36   :  { %694 = vsyncadd [#allocation7], 4294950912  ;;  %v75_v0 = vld [vmem:[#allocation6 + $0x8] sm:$0xff]  ;;  %v77_v1 = vld [vmem:[#allocation6 + $0x18] sm:$0xff]  ;;  %s702_s8 = smov [#allocation9]  }
  0x37   :  { %v74_v2 = vld [vmem:[#allocation6] sm:$0xff]  ;;  %v461_v3 = vpack.c.bf16 %v77_v1, %v75_v0  ;;  %v76_v4 = vld [vmem:[#allocation6 + $0x10] sm:$0xff]  ;;  %v79_v5 = vld [vmem:[#allocation6 + $0x28] sm:$0xff]  ;;  %s448_s9 = sshll.u32 %s702_s8, 4  ;;  %s449_s9 = int_to_ptr.vmem [resolvable:$true] %s448_s9 }
  0x38   :  { %v81_v6 = vld [vmem:[#allocation6 + $0x38] sm:$0xff]  ;;  %v463_v7 = vpack.c.bf16 %v76_v4, %v74_v2  ;;  %v78_v9 = vld [vmem:[#allocation6 + $0x20] sm:$0xff]  ;;  %v80_v10 = vld [vmem:[#allocation6 + $0x30] sm:$0xff]  ;;  %s669_s10 = scalar_lea.vmem %s449_s9, 512  ;;  %p674_p11 = scmp.lt.s32.totalorder %s449_s9, %s449_s9 }
  0x39   :  { %v465_v8 = vpack.c.bf16 %v81_v6, %v79_v5  ;;  %v83_v11 = vld [vmem:[#allocation6 + $0x48] sm:$0xff]  ;;  %462 = vmatprep.subr.bf16.mxu0 %v461_v3  ;;  %v85_v12 = vld [vmem:[#allocation6 + $0x58] sm:$0xff]  ;;  %v467_v13 = vpack.c.bf16 %v80_v10, %v78_v9  ;;  %v82_v15 = vld [vmem:[#allocation6 + $0x40] sm:$0xff]  ;;  %p670_p10 = scmp.ne.s32.totalorder %s449_s9, %s669_s10  ;;  %p675_p12 = scmp.lt.s32.totalorder %s669_s10, %s669_s10 }
  0x3a   :  { %464 = vmatpush1.bf16.msra.mxu0 %v463_v7  ;;  %v469_v14 = vpack.c.bf16 %v85_v12, %v83_v11  ;;  %v84_v16 = vld [vmem:[#allocation6 + $0x50] sm:$0xff]  ;;  %v87_v17 = vld [vmem:[#allocation6 + $0x68] sm:$0xff]  ;;  %v89_v18 = vld [vmem:[#allocation6 + $0x78] sm:$0xff] }
  0x3b   :  { %466 = vmatprep.subr.bf16.mxu0 %v465_v8  ;;  %v471_v19 = vpack.c.bf16 %v84_v16, %v82_v15  ;;  %v473_v20 = vpack.c.bf16 %v89_v18, %v87_v17  ;;  %v86_v21 = vld [vmem:[#allocation6 + $0x60] sm:$0xff]  ;;  %v88_v22 = vld [vmem:[#allocation6 + $0x70] sm:$0xff]  ;;  %v91_v23 = vld [vmem:[#allocation6 + $0x88] sm:$0xff]  ;;  %p676_p13 = por %p675_p12, %p674_p11 }
  0x3c   :  { %v93_v24 = vld [vmem:[#allocation6 + $0x98] sm:$0xff]  ;;  %v475_v25 = vpack.c.bf16 %v88_v22, %v86_v21  ;;  %v90_v27 = vld [vmem:[#allocation6 + $0x80] sm:$0xff]  ;;  %v92_v28 = vld [vmem:[#allocation6 + $0x90] sm:$0xff] }
  0x3d   :  { %v477_v26 = vpack.c.bf16 %v93_v24, %v91_v23  ;;  %v95_v29 = vld [vmem:[#allocation6 + $0xa8] sm:$0xff]  ;;  %v97_v30 = vld [vmem:[#allocation6 + $0xb8] sm:$0xff]  ;;  %v479_v31 = vpack.c.bf16 %v92_v28, %v90_v27  ;;  %v94_v33 = vld [vmem:[#allocation6 + $0xa0] sm:$0xff]  ;;  %p677_p0 = pnand %p676_p13, %p670_p10 }
  0x3e   :  { %468 = vmatpush1.bf16.msra.mxu0 %v467_v13  ;;  %v481_v32 = vpack.c.bf16 %v97_v30, %v95_v29  ;;  %v96_v34 = vld [vmem:[#allocation6 + $0xb0] sm:$0xff]  ;;  %v99_v35 = vld [vmem:[#allocation6 + $0xc8] sm:$0xff]  ;;  %v101_v36 = vld [vmem:[#allocation6 + $0xd8] sm:$0xff] }
  0x3f   :  { %470 = vmatprep.subr.bf16.mxu0 %v469_v14  ;;  %v483_v37 = vpack.c.bf16 %v96_v34, %v94_v33  ;;  %v485_v38 = vpack.c.bf16 %v101_v36, %v99_v35  ;;  %v98_v39 = vld [vmem:[#allocation6 + $0xc0] sm:$0xff]  ;;  %v100_v40 = vld [vmem:[#allocation6 + $0xd0] sm:$0xff]  ;;  %v71_v41 = vld [vmem:[#allocation3 + $0x8] sm:$0xff] }
  0x40   :  { %v103_v42 = vld [vmem:[#allocation6 + $0xe8] sm:$0xff]  ;;  %v105_v43 = vld [vmem:[#allocation6 + $0xf8] sm:$0xff]  ;;  %214 = vmatprep.mubr.f32.mxu0 %v71_v41  ;;  %v102_v45 = vld [vmem:[#allocation6 + $0xe0] sm:$0xff]  ;;  %v487_v50 = vpack.c.bf16 %v100_v40, %v98_v39 }
  0x41   :  { %v268_v44 = vld [vmem:[#allocation8 + $0x8] sm:$0xff]  ;;  %v104_v46 = vld [vmem:[#allocation6 + $0xf0] sm:$0xff]  ;;  %v270_v47 = vld [vmem:[#allocation8 + $0x18] sm:$0xff]  ;;  %v489_v56 = vpack.c.bf16 %v105_v43, %v103_v42 }
  0x42   :  { %472 = vmatpush1.bf16.msra.mxu0 %v471_v19  ;;  %v267_v48 = vld [vmem:[#allocation8] sm:$0xff]  ;;  %v269_v49 = vld [vmem:[#allocation8 + $0x10] sm:$0xff]  ;;  %v525_v51 = vpack.c.bf16 %v270_v47, %v268_v44  ;;  %v272_v53 = vld [vmem:[#allocation8 + $0x28] sm:$0xff]  ;;  %v491_v0 = vpack.c.bf16 %v104_v46, %v102_v45 }
  0x43   :  { %474 = vmatprep.subr.bf16.mxu0 %v473_v20  ;;  %v527_v52 = vpack.c.bf16 %v269_v49, %v267_v48  ;;  %v274_v54 = vld [vmem:[#allocation8 + $0x38] sm:$0xff]  ;;  %v271_v55 = vld [vmem:[#allocation8 + $0x20] sm:$0xff]  ;;  %v273_v58 = vld [vmem:[#allocation8 + $0x30] sm:$0xff] }
  0x44   :  { %v529_v57 = vpack.c.bf16 %v274_v54, %v272_v53  ;;  %v276_v59 = vld [vmem:[#allocation8 + $0x48] sm:$0xff]  ;;  %v278_v60 = vld [vmem:[#allocation8 + $0x58] sm:$0xff]  ;;  %526 = vmatprep.subr.bf16.mxu1 %v525_v51  ;;  %v531_v63 = vpack.c.bf16 %v273_v58, %v271_v55  ;;  %v106_v1 = vld [vmem:[#allocation6 + $0x100] sm:$0xff] }
  0x45   :  { %v107_v61 = vld [vmem:[#allocation6 + $0x108] sm:$0xff]  ;;  %v109_v62 = vld [vmem:[#allocation6 + $0x118] sm:$0xff]  ;;  %528 = vmatpush1.bf16.msra.mxu1 %v527_v52  ;;  %v533_v2 = vpack.c.bf16 %v278_v60, %v276_v59  ;;  %v275_v3 = vld [vmem:[#allocation8 + $0x40] sm:$0xff] }
  0x46   :  { %476 = vmatpush1.bf16.msra.mxu0 %v475_v25  ;;  %530 = vmatprep.subr.bf16.mxu1 %v529_v57  ;;  %v277_v4 = vld [vmem:[#allocation8 + $0x50] sm:$0xff]  ;;  %v493_v5 = vpack.c.bf16 %v109_v62, %v107_v61  ;;  %v280_v7 = vld [vmem:[#allocation8 + $0x68] sm:$0xff]  ;;  %v282_v8 = vld [vmem:[#allocation8 + $0x78] sm:$0xff] }
  0x47   :  { %478 = vmatprep.subr.bf16.mxu0 %v477_v26  ;;  %v108_v6 = vld [vmem:[#allocation6 + $0x110] sm:$0xff]  ;;  %v111_v9 = vld [vmem:[#allocation6 + $0x128] sm:$0xff]  ;;  %v113_v10 = vld [vmem:[#allocation6 + $0x138] sm:$0xff]  ;;  %v535_v11 = vpack.c.bf16 %v277_v4, %v275_v3  ;;  %v537_v14 = vpack.c.bf16 %v282_v8, %v280_v7 }
  0x48   :  { %v495_v12 = vpack.c.bf16 %v108_v6, %v106_v1  ;;  %v110_v13 = vld [vmem:[#allocation6 + $0x120] sm:$0xff]  ;;  %v281_v16 = vld [vmem:[#allocation8 + $0x70] sm:$0xff]  ;;  %v497_v17 = vpack.c.bf16 %v113_v10, %v111_v9  ;;  %v284_v19 = vld [vmem:[#allocation8 + $0x88] sm:$0xff] }
  0x49   :  { %532 = vmatpush1.bf16.msra.mxu1 %v531_v63  ;;  %v279_v15 = vld [vmem:[#allocation8 + $0x60] sm:$0xff]  ;;  %v112_v18 = vld [vmem:[#allocation6 + $0x130] sm:$0xff]  ;;  %v286_v20 = vld [vmem:[#allocation8 + $0x98] sm:$0xff] }
  0x4a   :  { %480 = vmatpush1.bf16.msra.mxu0 %v479_v31  ;;  %534 = vmatprep.subr.bf16.mxu1 %v533_v2  ;;  %v115_v21 = vld [vmem:[#allocation6 + $0x148] sm:$0xff]  ;;  %v117_v22 = vld [vmem:[#allocation6 + $0x158] sm:$0xff]  ;;  %v539_v23 = vpack.c.bf16 %v281_v16, %v279_v15  ;;  %v499_v24 = vpack.c.bf16 %v112_v18, %v110_v13  ;;  %v114_v25 = vld [vmem:[#allocation6 + $0x140] sm:$0xff]  ;;  %v541_v26 = vpack.c.bf16 %v286_v20, %v284_v19 }
  0x4b   :  { %482 = vmatprep.subr.bf16.mxu0 %v481_v32  ;;  %v283_v27 = vld [vmem:[#allocation8 + $0x80] sm:$0xff]  ;;  %v285_v28 = vld [vmem:[#allocation8 + $0x90] sm:$0xff]  ;;  %v501_v29 = vpack.c.bf16 %v117_v22, %v115_v21  ;;  %v288_v31 = vld [vmem:[#allocation8 + $0xa8] sm:$0xff] }
  0x4c   :  { %v116_v30 = vld [vmem:[#allocation6 + $0x150] sm:$0xff]  ;;  %v290_v32 = vld [vmem:[#allocation8 + $0xb8] sm:$0xff]  ;;  %v119_v33 = vld [vmem:[#allocation6 + $0x168] sm:$0xff]  ;;  %v543_v35 = vpack.c.bf16 %v285_v28, %v283_v27 }
  0x4d   :  { %536 = vmatpush1.bf16.msra.mxu1 %v535_v11  ;;  %v121_v34 = vld [vmem:[#allocation6 + $0x178] sm:$0xff]  ;;  %v503_v36 = vpack.c.bf16 %v116_v30, %v114_v25  ;;  %v287_v39 = vld [vmem:[#allocation8 + $0xa0] sm:$0xff]  ;;  %v289_v40 = vld [vmem:[#allocation8 + $0xb0] sm:$0xff] }
  0x4e   :  { %484 = vmatpush1.bf16.msra.mxu0 %v483_v37  ;;  %538 = vmatprep.subr.bf16.mxu1 %v537_v14  ;;  %v118_v37 = vld [vmem:[#allocation6 + $0x160] sm:$0xff]  ;;  %v505_v41 = vpack.c.bf16 %v121_v34, %v119_v33  ;;  %v120_v42 = vld [vmem:[#allocation6 + $0x170] sm:$0xff]  ;;  %v292_v43 = vld [vmem:[#allocation8 + $0xc8] sm:$0xff]  ;;  %v547_v47 = vpack.c.bf16 %v289_v40, %v287_v39 }
  0x4f   :  { %486 = vmatprep.subr.bf16.mxu0 %v485_v38  ;;  %v545_v38 = vpack.c.bf16 %v290_v32, %v288_v31  ;;  %v294_v44 = vld [vmem:[#allocation8 + $0xd8] sm:$0xff]  ;;  %v123_v45 = vld [vmem:[#allocation6 + $0x188] sm:$0xff]  ;;  %v507_v48 = vpack.c.bf16 %v120_v42, %v118_v37  ;;  %v122_v49 = vld [vmem:[#allocation6 + $0x180] sm:$0xff] }
  0x50   :  { %v125_v46 = vld [vmem:[#allocation6 + $0x198] sm:$0xff]  ;;  %v291_v51 = vld [vmem:[#allocation8 + $0xc0] sm:$0xff]  ;;  %v293_v52 = vld [vmem:[#allocation8 + $0xd0] sm:$0xff] }
  0x51   :  { %540 = vmatpush1.bf16.msra.mxu1 %v539_v23  ;;  %v509_v53 = vpack.c.bf16 %v125_v46, %v123_v45  ;;  %v124_v54 = vld [vmem:[#allocation6 + $0x190] sm:$0xff]  ;;  %v296_v55 = vld [vmem:[#allocation8 + $0xe8] sm:$0xff]  ;;  %v129_v58 = vld [vmem:[#allocation6 + $0x1b8] sm:$0xff]  ;;  %v551_v59 = vpack.c.bf16 %v293_v52, %v291_v51 }
  0x52   :  { %488 = vmatpush1.bf16.msra.mxu0 %v487_v50  ;;  %542 = vmatprep.subr.bf16.mxu1 %v541_v26  ;;  %v549_v50 = vpack.c.bf16 %v294_v44, %v292_v43  ;;  %v127_v57 = vld [vmem:[#allocation6 + $0x1a8] sm:$0xff]  ;;  %v511_v60 = vpack.c.bf16 %v124_v54, %v122_v49  ;;  %v295_v62 = vld [vmem:[#allocation8 + $0xe0] sm:$0xff]  ;;  %v297_v63 = vld [vmem:[#allocation8 + $0xf0] sm:$0xff] }
  0x53   :  { %490 = vmatprep.subr.bf16.mxu0 %v489_v56  ;;  %v298_v56 = vld [vmem:[#allocation8 + $0xf8] sm:$0xff]  ;;  %v126_v1 = vld [vmem:[#allocation6 + $0x1a0] sm:$0xff]  ;;  %v128_v2 = vld [vmem:[#allocation6 + $0x1b0] sm:$0xff] }
  0x54   :  { %v553_v61 = vpack.c.bf16 %v298_v56, %v296_v55  ;;  %v131_v3 = vld [vmem:[#allocation6 + $0x1c8] sm:$0xff]  ;;  %v133_v4 = vld [vmem:[#allocation6 + $0x1d8] sm:$0xff]  ;;  %v515_v6 = vpack.c.bf16 %v128_v2, %v126_v1  ;;  %v130_v8 = vld [vmem:[#allocation6 + $0x1c0] sm:$0xff] }
  0x55   :  { %544 = vmatpush1.bf16.msra.mxu1 %v543_v35  ;;  %v517_v7 = vpack.c.bf16 %v133_v4, %v131_v3  ;;  %v132_v9 = vld [vmem:[#allocation6 + $0x1d0] sm:$0xff]  ;;  %v135_v10 = vld [vmem:[#allocation6 + $0x1e8] sm:$0xff]  ;;  %v137_v11 = vld [vmem:[#allocation6 + $0x1f8] sm:$0xff]  ;;  %v140_v4 = vlaneseq }
  0x56   :  { %492 = vmatpush1.bf16.msra.mxu0 %v491_v0  ;;  %546 = vmatprep.subr.bf16.mxu1 %v545_v38  ;;  %v513_v0 = vpack.c.bf16 %v129_v58, %v127_v57  ;;  %v521_v13 = vpack.c.bf16 %v137_v11, %v135_v10  ;;  %v134_v14 = vld [vmem:[#allocation6 + $0x1e0] sm:$0xff]  ;;  %v136_v15 = vld [vmem:[#allocation6 + $0x1f0] sm:$0xff]  ;;  %v73_v18 = vld [vmem:[#allocation3 + $0x18] sm:$0xff] }
  0x57   :  { %494 = vmatprep.subr.bf16.mxu0 %v493_v5  ;;  %v555_v5 = vpack.c.bf16 %v297_v63, %v295_v62  ;;  %v523_v16 = vpack.c.bf16 %v136_v15, %v134_v14  ;;  %v72_v19 = vld [vmem:[#allocation3 + $0x10] sm:$0xff]  ;;  %v300_v20 = vld [vmem:[#allocation8 + $0x108] sm:$0xff]  ;;  %v302_v21 = vld [vmem:[#allocation8 + $0x118] sm:$0xff] }
  0x58   :  { %v557_v22 = vpack.c.bf16 %v302_v21, %v300_v20  ;;  %v299_v23 = vld [vmem:[#allocation8 + $0x100] sm:$0xff]  ;;  %v304_v26 = vld [vmem:[#allocation8 + $0x128] sm:$0xff]  ;;  %v306_v27 = vld [vmem:[#allocation8 + $0x138] sm:$0xff] }
  0x59   :  { %548 = vmatpush1.bf16.msra.mxu1 %v547_v47  ;;  %v561_v28 = vpack.c.bf16 %v306_v27, %v304_v26  ;;  %v305_v30 = vld [vmem:[#allocation8 + $0x130] sm:$0xff]  ;;  %v308_v32 = vld [vmem:[#allocation8 + $0x148] sm:$0xff]  ;;  %v310_v33 = vld [vmem:[#allocation8 + $0x158] sm:$0xff] }
  0x5a   :  { %496 = vmatpush1.bf16.msra.mxu0 %v495_v12  ;;  %550 = vmatprep.subr.bf16.mxu1 %v549_v50  ;;  %v519_v12 = vpack.c.bf16 %v132_v9, %v130_v8  ;;  %v565_v34 = vpack.c.bf16 %v310_v33, %v308_v32  ;;  %v307_v35 = vld [vmem:[#allocation8 + $0x140] sm:$0xff]  ;;  %v312_v38 = vld [vmem:[#allocation8 + $0x168] sm:$0xff]  ;;  %v314_v39 = vld [vmem:[#allocation8 + $0x178] sm:$0xff] }
  0x5b   :  { %498 = vmatprep.subr.bf16.mxu0 %v497_v17  ;;  %v70_v17 = vld [vmem:[#allocation3] sm:$0xff]  ;;  %v569_v40 = vpack.c.bf16 %v314_v39, %v312_v38  ;;  %v313_v42 = vld [vmem:[#allocation8 + $0x170] sm:$0xff]  ;;  %v316_v44 = vld [vmem:[#allocation8 + $0x188] sm:$0xff] }
  0x5c   :  { %v318_v45 = vld [vmem:[#allocation8 + $0x198] sm:$0xff]  ;;  %v315_v47 = vld [vmem:[#allocation8 + $0x180] sm:$0xff]  ;;  %v320_v50 = vld [vmem:[#allocation8 + $0x1a8] sm:$0xff] }
  0x5d   :  { %552 = vmatpush1.bf16.msra.mxu1 %v551_v59  ;;  %v573_v46 = vpack.c.bf16 %v318_v45, %v316_v44  ;;  %v322_v51 = vld [vmem:[#allocation8 + $0x1b8] sm:$0xff]  ;;  %v319_v52 = vld [vmem:[#allocation8 + $0x1a0] sm:$0xff]  ;;  %v321_v54 = vld [vmem:[#allocation8 + $0x1b0] sm:$0xff] }
  0x5e   :  { %500 = vmatpush1.bf16.msra.mxu0 %v499_v24  ;;  %554 = vmatprep.subr.bf16.mxu1 %v553_v61  ;;  %v301_v24 = vld [vmem:[#allocation8 + $0x110] sm:$0xff]  ;;  %v324_v55 = vld [vmem:[#allocation8 + $0x1c8] sm:$0xff]  ;;  %v326_v56 = vld [vmem:[#allocation8 + $0x1d8] sm:$0xff]  ;;  %v579_v57 = vpack.c.bf16 %v321_v54, %v319_v52 }
  0x5f   :  { %502 = vmatprep.subr.bf16.mxu0 %v501_v29  ;;  %v559_v25 = vpack.c.bf16 %v301_v24, %v299_v23  ;;  %v303_v29 = vld [vmem:[#allocation8 + $0x120] sm:$0xff]  ;;  %v581_v58 = vpack.c.bf16 %v326_v56, %v324_v55  ;;  %v328_v61 = vld [vmem:[#allocation8 + $0x1e8] sm:$0xff]  ;;  %v330_v62 = vld [vmem:[#allocation8 + $0x1f8] sm:$0xff] }
  0x60   :  { %v563_v31 = vpack.c.bf16 %v305_v30, %v303_v29  ;;  %v323_v59 = vld [vmem:[#allocation8 + $0x1c0] sm:$0xff]  ;;  %v329_v2 = vld [vmem:[#allocation8 + $0x1f0] sm:$0xff] }
  0x61   :  { %556 = vmatpush1.bf16.msra.mxu1 %v555_v5  ;;  %v327_v1 = vld [vmem:[#allocation8 + $0x1e0] sm:$0xff]  ;;  %v141_v5 = vshrl.u32 %v140_v4, 7 }
  0x62   :  { %504 = vmatpush1.bf16.msra.mxu0 %v503_v36  ;;  %558 = vmatprep.subr.bf16.mxu1 %v557_v22  ;;  %v309_v36 = vld [vmem:[#allocation8 + $0x150] sm:$0xff]  ;;  %v587_v3 = vpack.c.bf16 %v329_v2, %v327_v1  ;;  %v423_v55 = vld [vmem:[%s810_s4] sm:$0x3] }
  0x63   :  { %506 = vmatprep.subr.bf16.mxu0 %v505_v41  ;;  %v567_v37 = vpack.c.bf16 %v309_v36, %v307_v35  ;;  %v311_v41 = vld [vmem:[#allocation8 + $0x160] sm:$0xff]  ;;  %v146_v8 = vsub.s32 1, %v141_v5 }
  0x64   :  { %v571_v43 = vpack.c.bf16 %v313_v42, %v311_v41 }
  0x65   :  { %560 = vmatpush1.bf16.msra.mxu1 %v559_v25 }
  0x66   :  { %508 = vmatpush1.bf16.msra.mxu0 %v507_v48  ;;  %562 = vmatprep.subr.bf16.mxu1 %v561_v28  ;;  %v317_v48 = vld [vmem:[#allocation8 + $0x190] sm:$0xff] }
  0x67   :  { %510 = vmatprep.subr.bf16.mxu0 %v509_v53  ;;  %v575_v49 = vpack.c.bf16 %v317_v48, %v315_v47  ;;  %v577_v53 = vpack.c.bf16 %v322_v51, %v320_v50 }
  0x69   :  { %564 = vmatpush1.bf16.msra.mxu1 %v563_v31 }
  0x6a   :  { %512 = vmatpush1.bf16.msra.mxu0 %v511_v60  ;;  %566 = vmatprep.subr.bf16.mxu1 %v565_v34  ;;  %v325_v60 = vld [vmem:[#allocation8 + $0x1d0] sm:$0xff] }
  0x6b   :  { %514 = vmatprep.subr.bf16.mxu0 %v513_v0  ;;  %v583_v63 = vpack.c.bf16 %v325_v60, %v323_v59  ;;  %v585_v0 = vpack.c.bf16 %v330_v62, %v328_v61 }
  0x6d   :  { %568 = vmatpush1.bf16.msra.mxu1 %v567_v37 }
  0x6e   :  { %516 = vmatpush1.bf16.msra.mxu0 %v515_v6  ;;  %570 = vmatprep.subr.bf16.mxu1 %v569_v40  ;;  %v142_v6 = vsub.s32 0, %v141_v5 }
  0x6f   :  { %518 = vmatprep.subr.bf16.mxu0 %v517_v7  ;;  %v138_v7 = vld [vmem:[%s808_s2] sm:$0x3] }
  0x70   :  { %v143_v9 = vrot.slane %v138_v7, %v142_v6  ;;  %v147_v10 = vrot.slane %v138_v7, %v146_v8  ;;  %v428_v56 = vrot.slane %v423_v55, %v142_v6 }
  0x71   :  { %572 = vmatpush1.bf16.msra.mxu1 %v571_v43 }
  0x72   :  { %520 = vmatpush1.bf16.msra.mxu0 %v519_v12  ;;  %574 = vmatprep.subr.bf16.mxu1 %v573_v46 }
  0x73   :  { %522 = vmatprep.subr.bf16.mxu0 %v521_v13 }
  0x75   :  { %576 = vmatpush1.bf16.msra.mxu1 %v575_v49 }
  0x76   :  { %524 = vmatpush1.bf16.msra.mxu0 %v523_v16  ;;  %578 = vmatprep.subr.bf16.mxu1 %v577_v53 }
  0x79   :  { %215 = vmatmul.mubr.f32.vlgmr.msra.gmra.mrb[0].mxu0 %v70_v17  ;;  %580 = vmatpush1.bf16.msra.mxu1 %v579_v57  ;;  %v432_v57 = vrot.slane %v423_v55, %v146_v8 }
  0x7a   :  { %220 = vmatprep.mubr.f32.mxu0 %v73_v18  ;;  %582 = vmatprep.subr.bf16.mxu1 %v581_v58 }
  0x7d   :  { %221 = vmatmul.mubr.f32.gmra.mrb[2].mxu0 %v72_v19  ;;  %584 = vmatpush1.bf16.msra.mxu1 %v583_v63 }
  0x7e   :  { %586 = vmatprep.subr.bf16.mxu1 %v585_v0 }
  0x81   :  { %588 = vmatpush1.bf16.msra.mxu1 %v587_v3 }
 0x14c   :  { %v216_v11 = vpop.f32.mrb[0].mxu0 }
 0x14d   :  { %v217_v12 = vadd.f32 %v216_v11, %v143_v9  ;;  %v218_v13 = vpop.f32.mrb[1].mxu0 }
 0x14e   :  { %v219_v14 = vadd.f32 %v218_v13, %v147_v10 }
 0x14f   :  { %v227_v15 = vmul.f32 %v217_v12, %v217_v12 }
 0x150   :  { %v228_v16 = vmul.f32 %v219_v14, %v219_v14  ;;  %v222_v17 = vpop.f32.mrb[2].mxu0 }
 0x151   :  { %v231_v18 = vmul.f32 %v227_v15, %v217_v12  ;;  %v223_v19 = vadd.f32 %v222_v17, %v143_v9  ;;  %v224_v20 = vpop.f32.mrb[3].mxu0 }
 0x152   :  { %v232_v21 = vmul.f32 %v228_v16, %v219_v14  ;;  %v225_v22 = vadd.f32 %v224_v20, %v147_v10 }
 0x153   :  { %v235_v23 = vmul.f32 0.044715, %v231_v18  ;;  %v229_v24 = vmul.f32 %v223_v19, %v223_v19 }
 0x154   :  { %v230_v25 = vmul.f32 %v225_v22, %v225_v22  ;;  %v236_v26 = vmul.f32 0.044715, %v232_v21 }
 0x155   :  { %v239_v27 = vadd.f32 %v235_v23, %v217_v12  ;;  %v233_v28 = vmul.f32 %v229_v24, %v223_v19 }
 0x156   :  { %v234_v29 = vmul.f32 %v230_v25, %v225_v22  ;;  %v240_v30 = vadd.f32 %v236_v26, %v219_v14 }
 0x157   :  { %v243_v31 = vmul.f32 0.7978846, %v239_v27  ;;  %v237_v32 = vmul.f32 0.044715, %v233_v28 }
 0x158   :  { %v238_v33 = vmul.f32 0.044715, %v234_v29  ;;  %v244_v34 = vmul.f32 0.7978846, %v240_v30 }
 0x159   :  { %v241_v35 = vadd.f32 %v237_v32, %v223_v19  ;;  %595 = vtanh.f32 %v243_v31 }
 0x15a   :  { %v242_v36 = vadd.f32 %v238_v33, %v225_v22  ;;  %597 = vtanh.f32 %v244_v34 }
 0x15b   :  { %v245_v37 = vmul.f32 0.7978846, %v241_v35 }
 0x15c   :  { %v246_v38 = vmul.f32 0.7978846, %v242_v36 }
 0x15d   :  { %599 = vtanh.f32 %v245_v37 }
 0x15e   :  { %601 = vtanh.f32 %v246_v38 }
 0x163   :  { %v596_v39 = vpop.eup %595 }
 0x164   :  { %v598_v40 = vpop.eup %597  ;;  %v251_v41 = vadd.f32 1.0, %v596_v39 }
 0x165   :  { %v252_v42 = vadd.f32 1.0, %v598_v40 }
 0x166   :  { %v255_v43 = vmul.f32 0.5, %v251_v41 }
 0x167   :  { %v600_v44 = vpop.eup %599  ;;  %v256_v45 = vmul.f32 0.5, %v252_v42 }
 0x168   :  { %v602_v46 = vpop.eup %601  ;;  %v253_v47 = vadd.f32 1.0, %v600_v44  ;;  %v259_v50 = vmul.f32 %v255_v43, %v217_v12 }
 0x169   :  { %v260_v48 = vmul.f32 %v256_v45, %v219_v14  ;;  %v254_v49 = vadd.f32 1.0, %v602_v46 }
 0x16a   :  { %v257_v51 = vmul.f32 0.5, %v253_v47 }
 0x16b   :  { %395 = vmatprep.mubr.f32.mxu1 %v260_v48  ;;  %v258_v52 = vmul.f32 0.5, %v254_v49 }
 0x16c   :  { %396 = vmatmul.mubr.f32.vlgmr.msra.gmra.mrb[0].mxu1 %v259_v50  ;;  %v261_v54 = vmul.f32 %v257_v51, %v223_v19 }
 0x16d   :  { %v262_v53 = vmul.f32 %v258_v52, %v225_v22 }
 0x16f   :  { %401 = vmatprep.mubr.f32.mxu1 %v262_v53 }
 0x170   :  { %402 = vmatmul.mubr.f32.gmra.mrb[2].mxu1 %v261_v54 }
 0x23f   :  { %v397_v58 = vpop.f32.mrb[0].mxu1 }
 0x240   :  { %v435_v59 = vadd.f32 %v428_v56, %v397_v58  ;;  %v399_v60 = vpop.f32.mrb[1].mxu1 }
 0x241   :  { %v436_v61 = vadd.f32 %v432_v57, %v399_v60 }
 0x242   :  { %439 = vst [vmem:[#allocation9] sm:$0xff] %v435_v59 }
 0x243   :  { %440 = vst [vmem:[#allocation9 + $0x8] sm:$0xff] %v436_v61  ;;  %v403_v62 = vpop.f32.mrb[2].mxu1 }
 0x244   :  { %v437_v63 = vadd.f32 %v428_v56, %v403_v62  ;;  %v405_v0 = vpop.f32.mrb[3].mxu1 }
 0x245   :  { %v438_v1 = vadd.f32 %v432_v57, %v405_v0 }
 0x246   :  { %441 = vst [vmem:[#allocation9 + $0x10] sm:$0xff] %v437_v63 }
 0x247   :  { %442 = vst [vmem:[#allocation9 + $0x18] sm:$0xff] %v438_v1 }
 0x248   :  { %680 = shalt.err (!%p677_p0)
}
 0x249   :  { %s681_s12 = scalar_lea.hbm %s811_s5, 512 }
 0x24a   :  { %p682_p1 = scmp.ne.s32.totalorder %s811_s5, %s681_s12  ;;  %p685_p2 = scmp.lt.u32.totalorder %s681_s12, %s811_s5 }
 0x24c   :  { %p687_p3 = pnand %p685_p2, %p682_p1 }
 0x24e   :  { %690 = shalt.err (!%p687_p3)
}
 0x24f   :  { %454 = dma.vmem_to_hbm [thread:$0]  %s449_s9, 512, %s811_s5, [#allocation5], %s699_s30, %s699_s30, %s700_s6  }
 0x250   :  { %695 = dma.done.wait [#allocation5], 512  }
 0x251   :  { %696 = vsyncadd [#allocation5], 4294966784 }
 0x252   :  { %458 = vsyncpa [#allocation4], 1 }
 0x253   :  { %459 = vsyncpa [#allocation7], 1 }
 0x254   :  { %460 = vsyncpa [#allocation5], 1 }

// kernel: tpu_custom_call.1
= control target key start
LH: loop header
LB: loop body
LE: loop exit
PB: predicated region body
PF: predicated region fallthrough
CT: control target
= control target key end

     0   :  { %10 = vsyncpa [#allocation4], 0  ;;  %s806_s0 = inlined_call_operand.hbm [shape: f32[16,256], index: 0, kind: input, shape index: {}]   ;;  %s807_s1 = inlined_call_operand.hbm [shape: f32[256,256], index: 1, kind: input, shape index: {}]   ;;  %s808_s2 = inlined_call_operand.vmem [shape: f32[1,256], index: 2, kind: input, shape index: {}]   ;;  %s809_s3 = inlined_call_operand.hbm [shape: f32[256,256], index: 3, kind: input, shape index: {}]   ;;  %s810_s4 = inlined_call_operand.vmem [shape: f32[1,256], index: 4, kind: input, shape index: {}]   ;;  %s811_s5 = inlined_call_operand.hbm [shape: f32[16,256], index: 5, kind: output, shape index: {}]  }
   0x1   :  { %11 = vsyncpa [#allocation7], 0 }
   0x2   :  { %12 = vsyncpa [#allocation5], 0  ;;  %s697_s18 = smov [#allocation6]   ;;  %s698_s20 = smov [#allocation3]  }
   0x3   :  { %s30_s19 = sshll.u32 %s697_s18, 4  ;;  %s18_s21 = sshll.u32 %s698_s20, 4  ;;  %s31_s19 = int_to_ptr.vmem [resolvable:$true] %s30_s19  ;;  %s733_s21 = int_to_ptr.vmem [resolvable:$true] %s18_s21 }
   0x4   :  { %s603_s24 = scalar_lea.hbm %s807_s1, 8192 }
   0x5   :  { %p604_p0 = scmp.ne.s32.totalorder %s807_s1, %s603_s24  ;;  %p607_p1 = scmp.lt.u32.totalorder %s603_s24, %s807_s1 }
   0x7   :  { %p609_p2 = pnand %p607_p1, %p604_p0 }
   0x9   :  { %612 = shalt.err (!%p609_p2)
}
   0xa   :  { %s613_s29 = scalar_lea.vmem %s31_s19, 8192  ;;  %p618_p4 = scmp.lt.s32.totalorder %s31_s19, %s31_s19 }
   0xb   :  { %p614_p3 = scmp.ne.s32.totalorder %s31_s19, %s613_s29  ;;  %p619_p5 = scmp.lt.s32.totalorder %s613_s29, %s613_s29 }
   0xd   :  { %p620_p6 = por %p619_p5, %p618_p4 }
   0xf   :  { %p621_p7 = pnand %p620_p6, %p614_p3 }
  0x11   :  { %624 = shalt.err (!%p621_p7)
}
  0x12   :  { %s699_s30 = smov 256   ;;  %s700_s6 = smov 16  }
  0x13   :  { %36 = dma.hbm_to_vmem [thread:$0]  %s807_s1, 8192, %s31_s19, [#allocation7], %s699_s30, %s699_s30, %s700_s6  }
  0x14   :  { %s625_s11 = scalar_lea.hbm %s806_s0, 512 }
  0x15   :  { %p626_p8 = scmp.ne.s32.totalorder %s806_s0, %s625_s11  ;;  %p629_p9 = scmp.lt.u32.totalorder %s625_s11, %s806_s0 }
  0x17   :  { %p631_p10 = pnand %p629_p9, %p626_p8 }
  0x19   :  { %634 = shalt.err (!%p631_p10)
}
  0x1a   :  { %s635_s16 = scalar_lea.vmem %s733_s21, 512  ;;  %p640_p12 = scmp.lt.s32.totalorder %s733_s21, %s733_s21 }
  0x1b   :  { %p636_p11 = scmp.ne.s32.totalorder %s733_s21, %s635_s16  ;;  %p641_p13 = scmp.lt.s32.totalorder %s635_s16, %s635_s16 }
  0x1d   :  { %p642_p0 = por %p641_p13, %p640_p12 }
  0x1f   :  { %p643_p1 = pnand %p642_p0, %p636_p11 }
  0x21   :  { %646 = shalt.err (!%p643_p1)
}
  0x22   :  { %24 = dma.hbm_to_vmem [thread:$0]  %s806_s0, 512, %s733_s21, [#allocation4], %s699_s30, %s699_s30, %s700_s6  }
  0x23   :  { %s701_s18 = smov [#allocation8]   ;;  %s647_s23 = scalar_lea.hbm %s809_s3, 8192 }
  0x24   :  { %s44_s19 = sshll.u32 %s701_s18, 4  ;;  %p648_p2 = scmp.ne.s32.totalorder %s809_s3, %s647_s23  ;;  %s45_s19 = int_to_ptr.vmem [resolvable:$true] %s44_s19 }
  0x25   :  { %p651_p3 = scmp.lt.u32.totalorder %s647_s23, %s809_s3 }
  0x27   :  { %p653_p4 = pnand %p651_p3, %p648_p2 }
  0x29   :  { %656 = shalt.err (!%p653_p4)
}
  0x2a   :  { %s657_s28 = scalar_lea.vmem %s45_s19, 8192  ;;  %p662_p6 = scmp.lt.s32.totalorder %s45_s19, %s45_s19 }
  0x2b   :  { %p658_p5 = scmp.ne.s32.totalorder %s45_s19, %s657_s28  ;;  %p663_p7 = scmp.lt.s32.totalorder %s657_s28, %s657_s28 }
  0x2d   :  { %p664_p8 = por %p663_p7, %p662_p6 }
  0x2f   :  { %p665_p9 = pnand %p664_p8, %p658_p5 }
  0x31   :  { %668 = shalt.err (!%p665_p9)
}
  0x32   :  { %50 = dma.hbm_to_vmem [thread:$0]  %s809_s3, 8192, %s45_s19, [#allocation7], %s699_s30, %s699_s30, %s700_s6  }
  0x33   :  { %691 = dma.done.wait [#allocation4], 512  }
  0x34   :  { %692 = vsyncadd [#allocation4], 4294966784 }
  0x35   :  { %693 = dma.done.wait [#allocation7], 16384  }
  0x36   :  { %694 = vsyncadd [#allocation7], 4294950912  ;;  %v75_v0 = vld [vmem:[#allocation6 + $0x8] sm:$0xff]  ;;  %v77_v1 = vld [vmem:[#allocation6 + $0x18] sm:$0xff]  ;;  %s702_s8 = smov [#allocation9]  }
  0x37   :  { %v74_v2 = vld [vmem:[#allocation6] sm:$0xff]  ;;  %v461_v3 = vpack.c.bf16 %v77_v1, %v75_v0  ;;  %v76_v4 = vld [vmem:[#allocation6 + $0x10] sm:$0xff]  ;;  %v79_v5 = vld [vmem:[#allocation6 + $0x28] sm:$0xff]  ;;  %s448_s9 = sshll.u32 %s702_s8, 4  ;;  %s449_s9 = int_to_ptr.vmem [resolvable:$true] %s448_s9 }
  0x38   :  { %v81_v6 = vld [vmem:[#allocation6 + $0x38] sm:$0xff]  ;;  %v463_v7 = vpack.c.bf16 %v76_v4, %v74_v2  ;;  %v78_v9 = vld [vmem:[#allocation6 + $0x20] sm:$0xff]  ;;  %v80_v10 = vld [vmem:[#allocation6 + $0x30] sm:$0xff]  ;;  %s669_s10 = scalar_lea.vmem %s449_s9, 512  ;;  %p674_p11 = scmp.lt.s32.totalorder %s449_s9, %s449_s9 }
  0x39   :  { %v465_v8 = vpack.c.bf16 %v81_v6, %v79_v5  ;;  %v83_v11 = vld [vmem:[#allocation6 + $0x48] sm:$0xff]  ;;  %462 = vmatprep.subr.bf16.mxu0 %v461_v3  ;;  %v85_v12 = vld [vmem:[#allocation6 + $0x58] sm:$0xff]  ;;  %v467_v13 = vpack.c.bf16 %v80_v10, %v78_v9  ;;  %v82_v15 = vld [vmem:[#allocation6 + $0x40] sm:$0xff]  ;;  %p670_p10 = scmp.ne.s32.totalorder %s449_s9, %s669_s10  ;;  %p675_p12 = scmp.lt.s32.totalorder %s669_s10, %s669_s10 }
  0x3a   :  { %464 = vmatpush1.bf16.msra.mxu0 %v463_v7  ;;  %v469_v14 = vpack.c.bf16 %v85_v12, %v83_v11  ;;  %v84_v16 = vld [vmem:[#allocation6 + $0x50] sm:$0xff]  ;;  %v87_v17 = vld [vmem:[#allocation6 + $0x68] sm:$0xff]  ;;  %v89_v18 = vld [vmem:[#allocation6 + $0x78] sm:$0xff] }
  0x3b   :  { %466 = vmatprep.subr.bf16.mxu0 %v465_v8  ;;  %v471_v19 = vpack.c.bf16 %v84_v16, %v82_v15  ;;  %v473_v20 = vpack.c.bf16 %v89_v18, %v87_v17  ;;  %v86_v21 = vld [vmem:[#allocation6 + $0x60] sm:$0xff]  ;;  %v88_v22 = vld [vmem:[#allocation6 + $0x70] sm:$0xff]  ;;  %v91_v23 = vld [vmem:[#allocation6 + $0x88] sm:$0xff]  ;;  %p676_p13 = por %p675_p12, %p674_p11 }
  0x3c   :  { %v93_v24 = vld [vmem:[#allocation6 + $0x98] sm:$0xff]  ;;  %v475_v25 = vpack.c.bf16 %v88_v22, %v86_v21  ;;  %v90_v27 = vld [vmem:[#allocation6 + $0x80] sm:$0xff]  ;;  %v92_v28 = vld [vmem:[#allocation6 + $0x90] sm:$0xff] }
  0x3d   :  { %v477_v26 = vpack.c.bf16 %v93_v24, %v91_v23  ;;  %v95_v29 = vld [vmem:[#allocation6 + $0xa8] sm:$0xff]  ;;  %v97_v30 = vld [vmem:[#allocation6 + $0xb8] sm:$0xff]  ;;  %v479_v31 = vpack.c.bf16 %v92_v28, %v90_v27  ;;  %v94_v33 = vld [vmem:[#allocation6 + $0xa0] sm:$0xff]  ;;  %p677_p0 = pnand %p676_p13, %p670_p10 }
  0x3e   :  { %468 = vmatpush1.bf16.msra.mxu0 %v467_v13  ;;  %v481_v32 = vpack.c.bf16 %v97_v30, %v95_v29  ;;  %v96_v34 = vld [vmem:[#allocation6 + $0xb0] sm:$0xff]  ;;  %v99_v35 = vld [vmem:[#allocation6 + $0xc8] sm:$0xff]  ;;  %v101_v36 = vld [vmem:[#allocation6 + $0xd8] sm:$0xff] }
  0x3f   :  { %470 = vmatprep.subr.bf16.mxu0 %v469_v14  ;;  %v483_v37 = vpack.c.bf16 %v96_v34, %v94_v33  ;;  %v485_v38 = vpack.c.bf16 %v101_v36, %v99_v35  ;;  %v98_v39 = vld [vmem:[#allocation6 + $0xc0] sm:$0xff]  ;;  %v100_v40 = vld [vmem:[#allocation6 + $0xd0] sm:$0xff]  ;;  %v71_v41 = vld [vmem:[#allocation3 + $0x8] sm:$0xff] }
  0x40   :  { %v103_v42 = vld [vmem:[#allocation6 + $0xe8] sm:$0xff]  ;;  %v105_v43 = vld [vmem:[#allocation6 + $0xf8] sm:$0xff]  ;;  %214 = vmatprep.mubr.f32.mxu0 %v71_v41  ;;  %v102_v45 = vld [vmem:[#allocation6 + $0xe0] sm:$0xff]  ;;  %v487_v50 = vpack.c.bf16 %v100_v40, %v98_v39 }
  0x41   :  { %v268_v44 = vld [vmem:[#allocation8 + $0x8] sm:$0xff]  ;;  %v104_v46 = vld [vmem:[#allocation6 + $0xf0] sm:$0xff]  ;;  %v270_v47 = vld [vmem:[#allocation8 + $0x18] sm:$0xff]  ;;  %v489_v56 = vpack.c.bf16 %v105_v43, %v103_v42 }
  0x42   :  { %472 = vmatpush1.bf16.msra.mxu0 %v471_v19  ;;  %v267_v48 = vld [vmem:[#allocation8] sm:$0xff]  ;;  %v269_v49 = vld [vmem:[#allocation8 + $0x10] sm:$0xff]  ;;  %v525_v51 = vpack.c.bf16 %v270_v47, %v268_v44  ;;  %v272_v53 = vld [vmem:[#allocation8 + $0x28] sm:$0xff]  ;;  %v491_v0 = vpack.c.bf16 %v104_v46, %v102_v45 }
  0x43   :  { %474 = vmatprep.subr.bf16.mxu0 %v473_v20  ;;  %v527_v52 = vpack.c.bf16 %v269_v49, %v267_v48  ;;  %v274_v54 = vld [vmem:[#allocation8 + $0x38] sm:$0xff]  ;;  %v271_v55 = vld [vmem:[#allocation8 + $0x20] sm:$0xff]  ;;  %v273_v58 = vld [vmem:[#allocation8 + $0x30] sm:$0xff] }
  0x44   :  { %v529_v57 = vpack.c.bf16 %v274_v54, %v272_v53  ;;  %v276_v59 = vld [vmem:[#allocation8 + $0x48] sm:$0xff]  ;;  %v278_v60 = vld [vmem:[#allocation8 + $0x58] sm:$0xff]  ;;  %526 = vmatprep.subr.bf16.mxu1 %v525_v51  ;;  %v531_v63 = vpack.c.bf16 %v273_v58, %v271_v55  ;;  %v106_v1 = vld [vmem:[#allocation6 + $0x100] sm:$0xff] }
  0x45   :  { %v107_v61 = vld [vmem:[#allocation6 + $0x108] sm:$0xff]  ;;  %v109_v62 = vld [vmem:[#allocation6 + $0x118] sm:$0xff]  ;;  %528 = vmatpush1.bf16.msra.mxu1 %v527_v52  ;;  %v533_v2 = vpack.c.bf16 %v278_v60, %v276_v59  ;;  %v275_v3 = vld [vmem:[#allocation8 + $0x40] sm:$0xff] }
  0x46   :  { %476 = vmatpush1.bf16.msra.mxu0 %v475_v25  ;;  %530 = vmatprep.subr.bf16.mxu1 %v529_v57  ;;  %v277_v4 = vld [vmem:[#allocation8 + $0x50] sm:$0xff]  ;;  %v493_v5 = vpack.c.bf16 %v109_v62, %v107_v61  ;;  %v280_v7 = vld [vmem:[#allocation8 + $0x68] sm:$0xff]  ;;  %v282_v8 = vld [vmem:[#allocation8 + $0x78] sm:$0xff] }
  0x47   :  { %478 = vmatprep.subr.bf16.mxu0 %v477_v26  ;;  %v108_v6 = vld [vmem:[#allocation6 + $0x110] sm:$0xff]  ;;  %v111_v9 = vld [vmem:[#allocation6 + $0x128] sm:$0xff]  ;;  %v113_v10 = vld [vmem:[#allocation6 + $0x138] sm:$0xff]  ;;  %v535_v11 = vpack.c.bf16 %v277_v4, %v275_v3  ;;  %v537_v14 = vpack.c.bf16 %v282_v8, %v280_v7 }
  0x48   :  { %v495_v12 = vpack.c.bf16 %v108_v6, %v106_v1  ;;  %v110_v13 = vld [vmem:[#allocation6 + $0x120] sm:$0xff]  ;;  %v281_v16 = vld [vmem:[#allocation8 + $0x70] sm:$0xff]  ;;  %v497_v17 = vpack.c.bf16 %v113_v10, %v111_v9  ;;  %v284_v19 = vld [vmem:[#allocation8 + $0x88] sm:$0xff] }
  0x49   :  { %532 = vmatpush1.bf16.msra.mxu1 %v531_v63  ;;  %v279_v15 = vld [vmem:[#allocation8 + $0x60] sm:$0xff]  ;;  %v112_v18 = vld [vmem:[#allocation6 + $0x130] sm:$0xff]  ;;  %v286_v20 = vld [vmem:[#allocation8 + $0x98] sm:$0xff] }
  0x4a   :  { %480 = vmatpush1.bf16.msra.mxu0 %v479_v31  ;;  %534 = vmatprep.subr.bf16.mxu1 %v533_v2  ;;  %v115_v21 = vld [vmem:[#allocation6 + $0x148] sm:$0xff]  ;;  %v117_v22 = vld [vmem:[#allocation6 + $0x158] sm:$0xff]  ;;  %v539_v23 = vpack.c.bf16 %v281_v16, %v279_v15  ;;  %v499_v24 = vpack.c.bf16 %v112_v18, %v110_v13  ;;  %v114_v25 = vld [vmem:[#allocation6 + $0x140] sm:$0xff]  ;;  %v541_v26 = vpack.c.bf16 %v286_v20, %v284_v19 }
  0x4b   :  { %482 = vmatprep.subr.bf16.mxu0 %v481_v32  ;;  %v283_v27 = vld [vmem:[#allocation8 + $0x80] sm:$0xff]  ;;  %v285_v28 = vld [vmem:[#allocation8 + $0x90] sm:$0xff]  ;;  %v501_v29 = vpack.c.bf16 %v117_v22, %v115_v21  ;;  %v288_v31 = vld [vmem:[#allocation8 + $0xa8] sm:$0xff] }
  0x4c   :  { %v116_v30 = vld [vmem:[#allocation6 + $0x150] sm:$0xff]  ;;  %v290_v32 = vld [vmem:[#allocation8 + $0xb8] sm:$0xff]  ;;  %v119_v33 = vld [vmem:[#allocation6 + $0x168] sm:$0xff]  ;;  %v543_v35 = vpack.c.bf16 %v285_v28, %v283_v27 }
  0x4d   :  { %536 = vmatpush1.bf16.msra.mxu1 %v535_v11  ;;  %v121_v34 = vld [vmem:[#allocation6 + $0x178] sm:$0xff]  ;;  %v503_v36 = vpack.c.bf16 %v116_v30, %v114_v25  ;;  %v287_v39 = vld [vmem:[#allocation8 + $0xa0] sm:$0xff]  ;;  %v289_v40 = vld [vmem:[#allocation8 + $0xb0] sm:$0xff] }
  0x4e   :  { %484 = vmatpush1.bf16.msra.mxu0 %v483_v37  ;;  %538 = vmatprep.subr.bf16.mxu1 %v537_v14  ;;  %v118_v37 = vld [vmem:[#allocation6 + $0x160] sm:$0xff]  ;;  %v505_v41 = vpack.c.bf16 %v121_v34, %v119_v33  ;;  %v120_v42 = vld [vmem:[#allocation6 + $0x170] sm:$0xff]  ;;  %v292_v43 = vld [vmem:[#allocation8 + $0xc8] sm:$0xff]  ;;  %v547_v47 = vpack.c.bf16 %v289_v40, %v287_v39 }
  0x4f   :  { %486 = vmatprep.subr.bf16.mxu0 %v485_v38  ;;  %v545_v38 = vpack.c.bf16 %v290_v32, %v288_v31  ;;  %v294_v44 = vld [vmem:[#allocation8 + $0xd8] sm:$0xff]  ;;  %v123_v45 = vld [vmem:[#allocation6 + $0x188] sm:$0xff]  ;;  %v507_v48 = vpack.c.bf16 %v120_v42, %v118_v37  ;;  %v122_v49 = vld [vmem:[#allocation6 + $0x180] sm:$0xff] }
  0x50   :  { %v125_v46 = vld [vmem:[#allocation6 + $0x198] sm:$0xff]  ;;  %v291_v51 = vld [vmem:[#allocation8 + $0xc0] sm:$0xff]  ;;  %v293_v52 = vld [vmem:[#allocation8 + $0xd0] sm:$0xff] }
  0x51   :  { %540 = vmatpush1.bf16.msra.mxu1 %v539_v23  ;;  %v509_v53 = vpack.c.bf16 %v125_v46, %v123_v45  ;;  %v124_v54 = vld [vmem:[#allocation6 + $0x190] sm:$0xff]  ;;  %v296_v55 = vld [vmem:[#allocation8 + $0xe8] sm:$0xff]  ;;  %v129_v58 = vld [vmem:[#allocation6 + $0x1b8] sm:$0xff]  ;;  %v551_v59 = vpack.c.bf16 %v293_v52, %v291_v51 }
  0x52   :  { %488 = vmatpush1.bf16.msra.mxu0 %v487_v50  ;;  %542 = vmatprep.subr.bf16.mxu1 %v541_v26  ;;  %v549_v50 = vpack.c.bf16 %v294_v44, %v292_v43  ;;  %v127_v57 = vld [vmem:[#allocation6 + $0x1a8] sm:$0xff]  ;;  %v511_v60 = vpack.c.bf16 %v124_v54, %v122_v49  ;;  %v295_v62 = vld [vmem:[#allocation8 + $0xe0] sm:$0xff]  ;;  %v297_v63 = vld [vmem:[#allocation8 + $0xf0] sm:$0xff] }
  0x53   :  { %490 = vmatprep.subr.bf16.mxu0 %v489_v56  ;;  %v298_v56 = vld [vmem:[#allocation8 + $0xf8] sm:$0xff]  ;;  %v126_v1 = vld [vmem:[#allocation6 + $0x1a0] sm:$0xff]  ;;  %v128_v2 = vld [vmem:[#allocation6 + $0x1b0] sm:$0xff] }
  0x54   :  { %v553_v61 = vpack.c.bf16 %v298_v56, %v296_v55  ;;  %v131_v3 = vld [vmem:[#allocation6 + $0x1c8] sm:$0xff]  ;;  %v133_v4 = vld [vmem:[#allocation6 + $0x1d8] sm:$0xff]  ;;  %v515_v6 = vpack.c.bf16 %v128_v2, %v126_v1  ;;  %v130_v8 = vld [vmem:[#allocation6 + $0x1c0] sm:$0xff] }
  0x55   :  { %544 = vmatpush1.bf16.msra.mxu1 %v543_v35  ;;  %v517_v7 = vpack.c.bf16 %v133_v4, %v131_v3  ;;  %v132_v9 = vld [vmem:[#allocation6 + $0x1d0] sm:$0xff]  ;;  %v135_v10 = vld [vmem:[#allocation6 + $0x1e8] sm:$0xff]  ;;  %v137_v11 = vld [vmem:[#allocation6 + $0x1f8] sm:$0xff]  ;;  %v140_v4 = vlaneseq }
  0x56   :  { %492 = vmatpush1.bf16.msra.mxu0 %v491_v0  ;;  %546 = vmatprep.subr.bf16.mxu1 %v545_v38  ;;  %v513_v0 = vpack.c.bf16 %v129_v58, %v127_v57  ;;  %v521_v13 = vpack.c.bf16 %v137_v11, %v135_v10  ;;  %v134_v14 = vld [vmem:[#allocation6 + $0x1e0] sm:$0xff]  ;;  %v136_v15 = vld [vmem:[#allocation6 + $0x1f0] sm:$0xff]  ;;  %v73_v18 = vld [vmem:[#allocation3 + $0x18] sm:$0xff] }
  0x57   :  { %494 = vmatprep.subr.bf16.mxu0 %v493_v5  ;;  %v555_v5 = vpack.c.bf16 %v297_v63, %v295_v62  ;;  %v523_v16 = vpack.c.bf16 %v136_v15, %v134_v14  ;;  %v72_v19 = vld [vmem:[#allocation3 + $0x10] sm:$0xff]  ;;  %v300_v20 = vld [vmem:[#allocation8 + $0x108] sm:$0xff]  ;;  %v302_v21 = vld [vmem:[#allocation8 + $0x118] sm:$0xff] }
  0x58   :  { %v557_v22 = vpack.c.bf16 %v302_v21, %v300_v20  ;;  %v299_v23 = vld [vmem:[#allocation8 + $0x100] sm:$0xff]  ;;  %v304_v26 = vld [vmem:[#allocation8 + $0x128] sm:$0xff]  ;;  %v306_v27 = vld [vmem:[#allocation8 + $0x138] sm:$0xff] }
  0x59   :  { %548 = vmatpush1.bf16.msra.mxu1 %v547_v47  ;;  %v561_v28 = vpack.c.bf16 %v306_v27, %v304_v26  ;;  %v305_v30 = vld [vmem:[#allocation8 + $0x130] sm:$0xff]  ;;  %v308_v32 = vld [vmem:[#allocation8 + $0x148] sm:$0xff]  ;;  %v310_v33 = vld [vmem:[#allocation8 + $0x158] sm:$0xff] }
  0x5a   :  { %496 = vmatpush1.bf16.msra.mxu0 %v495_v12  ;;  %550 = vmatprep.subr.bf16.mxu1 %v549_v50  ;;  %v519_v12 = vpack.c.bf16 %v132_v9, %v130_v8  ;;  %v565_v34 = vpack.c.bf16 %v310_v33, %v308_v32  ;;  %v307_v35 = vld [vmem:[#allocation8 + $0x140] sm:$0xff]  ;;  %v312_v38 = vld [vmem:[#allocation8 + $0x168] sm:$0xff]  ;;  %v314_v39 = vld [vmem:[#allocation8 + $0x178] sm:$0xff] }
  0x5b   :  { %498 = vmatprep.subr.bf16.mxu0 %v497_v17  ;;  %v70_v17 = vld [vmem:[#allocation3] sm:$0xff]  ;;  %v569_v40 = vpack.c.bf16 %v314_v39, %v312_v38  ;;  %v313_v42 = vld [vmem:[#allocation8 + $0x170] sm:$0xff]  ;;  %v316_v44 = vld [vmem:[#allocation8 + $0x188] sm:$0xff] }
  0x5c   :  { %v318_v45 = vld [vmem:[#allocation8 + $0x198] sm:$0xff]  ;;  %v315_v47 = vld [vmem:[#allocation8 + $0x180] sm:$0xff]  ;;  %v320_v50 = vld [vmem:[#allocation8 + $0x1a8] sm:$0xff] }
  0x5d   :  { %552 = vmatpush1.bf16.msra.mxu1 %v551_v59  ;;  %v573_v46 = vpack.c.bf16 %v318_v45, %v316_v44  ;;  %v322_v51 = vld [vmem:[#allocation8 + $0x1b8] sm:$0xff]  ;;  %v319_v52 = vld [vmem:[#allocation8 + $0x1a0] sm:$0xff]  ;;  %v321_v54 = vld [vmem:[#allocation8 + $0x1b0] sm:$0xff] }
  0x5e   :  { %500 = vmatpush1.bf16.msra.mxu0 %v499_v24  ;;  %554 = vmatprep.subr.bf16.mxu1 %v553_v61  ;;  %v301_v24 = vld [vmem:[#allocation8 + $0x110] sm:$0xff]  ;;  %v324_v55 = vld [vmem:[#allocation8 + $0x1c8] sm:$0xff]  ;;  %v326_v56 = vld [vmem:[#allocation8 + $0x1d8] sm:$0xff]  ;;  %v579_v57 = vpack.c.bf16 %v321_v54, %v319_v52 }
  0x5f   :  { %502 = vmatprep.subr.bf16.mxu0 %v501_v29  ;;  %v559_v25 = vpack.c.bf16 %v301_v24, %v299_v23  ;;  %v303_v29 = vld [vmem:[#allocation8 + $0x120] sm:$0xff]  ;;  %v581_v58 = vpack.c.bf16 %v326_v56, %v324_v55  ;;  %v328_v61 = vld [vmem:[#allocation8 + $0x1e8] sm:$0xff]  ;;  %v330_v62 = vld [vmem:[#allocation8 + $0x1f8] sm:$0xff] }
  0x60   :  { %v563_v31 = vpack.c.bf16 %v305_v30, %v303_v29  ;;  %v323_v59 = vld [vmem:[#allocation8 + $0x1c0] sm:$0xff]  ;;  %v329_v2 = vld [vmem:[#allocation8 + $0x1f0] sm:$0xff] }
  0x61   :  { %556 = vmatpush1.bf16.msra.mxu1 %v555_v5  ;;  %v327_v1 = vld [vmem:[#allocation8 + $0x1e0] sm:$0xff]  ;;  %v141_v5 = vshrl.u32 %v140_v4, 7 }
  0x62   :  { %504 = vmatpush1.bf16.msra.mxu0 %v503_v36  ;;  %558 = vmatprep.subr.bf16.mxu1 %v557_v22  ;;  %v309_v36 = vld [vmem:[#allocation8 + $0x150] sm:$0xff]  ;;  %v587_v3 = vpack.c.bf16 %v329_v2, %v327_v1  ;;  %v423_v55 = vld [vmem:[%s810_s4] sm:$0x3] }
  0x63   :  { %506 = vmatprep.subr.bf16.mxu0 %v505_v41  ;;  %v567_v37 = vpack.c.bf16 %v309_v36, %v307_v35  ;;  %v311_v41 = vld [vmem:[#allocation8 + $0x160] sm:$0xff]  ;;  %v146_v8 = vsub.s32 1, %v141_v5 }
  0x64   :  { %v571_v43 = vpack.c.bf16 %v313_v42, %v311_v41 }
  0x65   :  { %560 = vmatpush1.bf16.msra.mxu1 %v559_v25 }
  0x66   :  { %508 = vmatpush1.bf16.msra.mxu0 %v507_v48  ;;  %562 = vmatprep.subr.bf16.mxu1 %v561_v28  ;;  %v317_v48 = vld [vmem:[#allocation8 + $0x190] sm:$0xff] }
  0x67   :  { %510 = vmatprep.subr.bf16.mxu0 %v509_v53  ;;  %v575_v49 = vpack.c.bf16 %v317_v48, %v315_v47  ;;  %v577_v53 = vpack.c.bf16 %v322_v51, %v320_v50 }
  0x69   :  { %564 = vmatpush1.bf16.msra.mxu1 %v563_v31 }
  0x6a   :  { %512 = vmatpush1.bf16.msra.mxu0 %v511_v60  ;;  %566 = vmatprep.subr.bf16.mxu1 %v565_v34  ;;  %v325_v60 = vld [vmem:[#allocation8 + $0x1d0] sm:$0xff] }
  0x6b   :  { %514 = vmatprep.subr.bf16.mxu0 %v513_v0  ;;  %v583_v63 = vpack.c.bf16 %v325_v60, %v323_v59  ;;  %v585_v0 = vpack.c.bf16 %v330_v62, %v328_v61 }
  0x6d   :  { %568 = vmatpush1.bf16.msra.mxu1 %v567_v37 }
  0x6e   :  { %516 = vmatpush1.bf16.msra.mxu0 %v515_v6  ;;  %570 = vmatprep.subr.bf16.mxu1 %v569_v40  ;;  %v142_v6 = vsub.s32 0, %v141_v5 }
  0x6f   :  { %518 = vmatprep.subr.bf16.mxu0 %v517_v7  ;;  %v138_v7 = vld [vmem:[%s808_s2] sm:$0x3] }
  0x70   :  { %v143_v9 = vrot.slane %v138_v7, %v142_v6  ;;  %v147_v10 = vrot.slane %v138_v7, %v146_v8  ;;  %v428_v56 = vrot.slane %v423_v55, %v142_v6 }
  0x71   :  { %572 = vmatpush1.bf16.msra.mxu1 %v571_v43 }
  0x72   :  { %520 = vmatpush1.bf16.msra.mxu0 %v519_v12  ;;  %574 = vmatprep.subr.bf16.mxu1 %v573_v46 }
  0x73   :  { %522 = vmatprep.subr.bf16.mxu0 %v521_v13 }
  0x75   :  { %576 = vmatpush1.bf16.msra.mxu1 %v575_v49 }
  0x76   :  { %524 = vmatpush1.bf16.msra.mxu0 %v523_v16  ;;  %578 = vmatprep.subr.bf16.mxu1 %v577_v53 }
  0x79   :  { %215 = vmatmul.mubr.f32.vlgmr.msra.gmra.mrb[0].mxu0 %v70_v17  ;;  %580 = vmatpush1.bf16.msra.mxu1 %v579_v57  ;;  %v432_v57 = vrot.slane %v423_v55, %v146_v8 }
  0x7a   :  { %220 = vmatprep.mubr.f32.mxu0 %v73_v18  ;;  %582 = vmatprep.subr.bf16.mxu1 %v581_v58 }
  0x7d   :  { %221 = vmatmul.mubr.f32.gmra.mrb[2].mxu0 %v72_v19  ;;  %584 = vmatpush1.bf16.msra.mxu1 %v583_v63 }
  0x7e   :  { %586 = vmatprep.subr.bf16.mxu1 %v585_v0 }
  0x81   :  { %588 = vmatpush1.bf16.msra.mxu1 %v587_v3 }
 0x14c   :  { %v216_v11 = vpop.f32.mrb[0].mxu0 }
 0x14d   :  { %v217_v12 = vadd.f32 %v216_v11, %v143_v9  ;;  %v218_v13 = vpop.f32.mrb[1].mxu0 }
 0x14e   :  { %v219_v14 = vadd.f32 %v218_v13, %v147_v10 }
 0x14f   :  { %v227_v15 = vmul.f32 %v217_v12, %v217_v12 }
 0x150   :  { %v228_v16 = vmul.f32 %v219_v14, %v219_v14  ;;  %v222_v17 = vpop.f32.mrb[2].mxu0 }
 0x151   :  { %v231_v18 = vmul.f32 %v227_v15, %v217_v12  ;;  %v223_v19 = vadd.f32 %v222_v17, %v143_v9  ;;  %v224_v20 = vpop.f32.mrb[3].mxu0 }
 0x152   :  { %v232_v21 = vmul.f32 %v228_v16, %v219_v14  ;;  %v225_v22 = vadd.f32 %v224_v20, %v147_v10 }
 0x153   :  { %v235_v23 = vmul.f32 0.044715, %v231_v18  ;;  %v229_v24 = vmul.f32 %v223_v19, %v223_v19 }
 0x154   :  { %v230_v25 = vmul.f32 %v225_v22, %v225_v22  ;;  %v236_v26 = vmul.f32 0.044715, %v232_v21 }
 0x155   :  { %v239_v27 = vadd.f32 %v235_v23, %v217_v12  ;;  %v233_v28 = vmul.f32 %v229_v24, %v223_v19 }
 0x156   :  { %v234_v29 = vmul.f32 %v230_v25, %v225_v22  ;;  %v240_v30 = vadd.f32 %v236_v26, %v219_v14 }
 0x157   :  { %v243_v31 = vmul.f32 0.7978846, %v239_v27  ;;  %v237_v32 = vmul.f32 0.044715, %v233_v28 }
 0x158   :  { %v238_v33 = vmul.f32 0.044715, %v234_v29  ;;  %v244_v34 = vmul.f32 0.7978846, %v240_v30 }
 0x159   :  { %v241_v35 = vadd.f32 %v237_v32, %v223_v19  ;;  %595 = vtanh.f32 %v243_v31 }
 0x15a   :  { %v242_v36 = vadd.f32 %v238_v33, %v225_v22  ;;  %597 = vtanh.f32 %v244_v34 }
 0x15b   :  { %v245_v37 = vmul.f32 0.7978846, %v241_v35 }
 0x15c   :  { %v246_v38 = vmul.f32 0.7978846, %v242_v36 }
 0x15d   :  { %599 = vtanh.f32 %v245_v37 }
 0x15e   :  { %601 = vtanh.f32 %v246_v38 }
 0x163   :  { %v596_v39 = vpop.eup %595 }
 0x164   :  { %v598_v40 = vpop.eup %597  ;;  %v251_v41 = vadd.f32 1.0, %v596_v39 }
 0x165   :  { %v252_v42 = vadd.f32 1.0, %v598_v40 }
 0x166   :  { %v255_v43 = vmul.f32 0.5, %v251_v41 }
 0x167   :  { %v600_v44 = vpop.eup %599  ;;  %v256_v45 = vmul.f32 0.5, %v252_v42 }
 0x168   :  { %v602_v46 = vpop.eup %601  ;;  %v253_v47 = vadd.f32 1.0, %v600_v44  ;;  %v259_v50 = vmul.f32 %v255_v43, %v217_v12 }
 0x169   :  { %v260_v48 = vmul.f32 %v256_v45, %v219_v14  ;;  %v254_v49 = vadd.f32 1.0, %v602_v46 }
 0x16a   :  { %v257_v51 = vmul.f32 0.5, %v253_v47 }
 0x16b   :  { %395 = vmatprep.mubr.f32.mxu1 %v260_v48  ;;  %v258_v52 = vmul.f32 0.5, %v254_v49 }
 0x16c   :  { %396 = vmatmul.mubr.f32.vlgmr.msra.gmra.mrb[0].mxu1 %v259_v50  ;;  %v261_v54 = vmul.f32 %v257_v51, %v223_v19 }
 0x16d   :  { %v262_v53 = vmul.f32 %v258_v52, %v225_v22 }
 0x16f   :  { %401 = vmatprep.mubr.f32.mxu1 %v262_v53 }
 0x170   :  { %402 = vmatmul.mubr.f32.gmra.mrb[2].mxu1 %v261_v54 }
 0x23f   :  { %v397_v58 = vpop.f32.mrb[0].mxu1 }
 0x240   :  { %v435_v59 = vadd.f32 %v428_v56, %v397_v58  ;;  %v399_v60 = vpop.f32.mrb[1].mxu1 }
 0x241   :  { %v436_v61 = vadd.f32 %v432_v57, %v399_v60 }
 0x242   :  { %439 = vst [vmem:[#allocation9] sm:$0xff] %v435_v59 }
 0x243   :  { %440 = vst [vmem:[#allocation9 + $0x8] sm:$0xff] %v436_v61  ;;  %v403_v62 = vpop.f32.mrb[2].mxu1 }
 0x244   :  { %v437_v63 = vadd.f32 %v428_v56, %v403_v62  ;;  %v405_v0 = vpop.f32.mrb[3].mxu1 }
 0x245   :  { %v438_v1 = vadd.f32 %v432_v57, %v405_v0 }
 0x246   :  { %441 = vst [vmem:[#allocation9 + $0x10] sm:$0xff] %v437_v63 }
 0x247   :  { %442 = vst [vmem:[#allocation9 + $0x18] sm:$0xff] %v438_v1 }
 0x248   :  { %680 = shalt.err (!%p677_p0)
}
 0x249   :  { %s681_s12 = scalar_lea.hbm %s811_s5, 512 }
 0x24a   :  { %p682_p1 = scmp.ne.s32.totalorder %s811_s5, %s681_s12  ;;  %p685_p2 = scmp.lt.u32.totalorder %s681_s12, %s811_s5 }
 0x24c   :  { %p687_p3 = pnand %p685_p2, %p682_p1 }
 0x24e   :  { %690 = shalt.err (!%p687_p3)
}
 0x24f   :  { %454 = dma.vmem_to_hbm [thread:$0]  %s449_s9, 512, %s811_s5, [#allocation5], %s699_s30, %s699_s30, %s700_s6  }
 0x250   :  { %695 = dma.done.wait [#allocation5], 512  }
 0x251   :  { %696 = vsyncadd [#allocation5], 4294966784 }
 0x252   :  { %458 = vsyncpa [#allocation4], 1 }
 0x253   :  { %459 = vsyncpa [#allocation7], 1 }
 0x254   :  { %460 = vsyncpa [#allocation5], 1 }

</bundles_post_ra>
